<compile_context>
chip_gen: v7x
topology: tpu7x:2x2x1
jax: 0.10.0
libtpu: 0.0.40
codegen_flags: <defaults>
</compile_context>

<pallas_src>
import functools

import jax
import jax.numpy as jnp
import numpy as np
from jax import lax
from jax.experimental import pallas as pl
from jax.experimental.pallas import tpu as pltpu

NEG_SLOPE = 0.2

# MXU operand dtype. float32 keeps full precision on every generation (and keeps the
# 2e-3 correctness check safe on v5e, whose VPU/EUP are f32-only). On v6e/v7x this can
# be flipped to jnp.bfloat16 for ~2-4x MXU throughput and half the weight DMA bytes
# (re-validate tolerances); accumulation stays f32 via preferred_element_type.
MXU_DTYPE = jnp.float32

# Tile caps: past ~16k lanes the MXU N-dim / HBM BW are already saturated, and the
# unrolled regroup loop scales with bt, so bigger tiles only cost VMEM / compile time.
MAX_LANE_TILE = 16384
MAX_BT = 128


def _leaky(v):
    return jnp.where(v > 0, v, NEG_SLOPE * v)


def _mxu(v):
    return v if MXU_DTYPE == jnp.float32 else v.astype(MXU_DTYPE)


def _round_up(x, m):
    return (x + m - 1) // m * m


def _vmem_capacity_bytes():
    try:
        return int(pltpu.get_tpu_info().vmem_capacity_bytes)
    except Exception:
        return 64 << 20                     # conservative fallback (v7x per-TC VMEM)


def _tensorcores_per_chip():
    # "parallel" grid axes are sharded across TensorCores on multi-TC chips
    # (v4/v5p megacore, v7x).  v5e/v6e have a single TC.
    try:
        kind = jax.devices()[0].device_kind.lower()
    except Exception:
        return 1
    return 2 if any(t in kind for t in ("v7", "7x", "v4", "v5p")) else 1


def _choose_batch_tile(batch, length, hidden, c_in, p, weight_bytes):
    """Pick the LARGEST batch tile whose working set fits the VMEM budget.

    Tiles keep bt*length lane-dense (multiple of 128) and bt*hidden a multiple of 8
    unless the whole batch is one block (full-array blocks are always legal).  On
    multi-TensorCore chips prefer an even number of grid steps.
    """
    cap = _vmem_capacity_bytes()
    vmem_limit = min(cap * 3 // 4, 96 << 20)
    budget = vmem_limit - weight_bytes - (2 << 20)
    hm = max(hidden, c_in)

    def legal(bt):
        if bt == batch:
            return True
        return (bt * length) % 128 == 0 and (bt * hidden) % 8 == 0

    def est_bytes(bt):
        btl, bth = bt * length, bt * hidden
        acts = (2 * c_in * btl               # input tile (double-buffered)
                + 2 * 2 * btl                # packed edge masks (double-buffered)
                + 2 * bth * p                # output tile (double-buffered)
                + 3 * hm * btl               # conv-tap scratch
                + bth * length               # regroup scratch
                + 4 * hidden * btl           # conv temporaries (h, shifted taps, acc)
                + 4 * bth * max(length, hidden, p))   # fc / head / softmax temporaries
        return 4 * acts

    divisors = [d for d in range(batch, 0, -1) if batch % d == 0]
    fitting = [bt for bt in divisors
               if legal(bt) and est_bytes(bt) <= budget
               and bt * length <= MAX_LANE_TILE and bt <= MAX_BT]
    if not fitting:
        bt = [d for d in divisors if legal(d)][-1]    # smallest legal tile
        return bt, vmem_limit

    bt = fitting[0]                                   # largest fitting tile
    if _tensorcores_per_chip() >= 2:
        # Keep both TensorCores busy: prefer the largest tile giving an even #steps.
        for cand in fitting:
            steps = batch // cand
            if steps >= 2 and steps % 2 == 0:
                bt = cand
                break
    return bt, vmem_limit


def encoder_kernel(x_ref, edges_ref,
                   w1_ref, b1_ref, w2_ref, b2_ref, w3_ref, b3_ref,
                   wfc_ref, bfc_ref, wh_ref, bh_ref,
                   out_ref, taps_ref, ht_ref, *, bt, length, lk, k):
    hidden = w2_ref.shape[0]
    p = wh_ref.shape[1]
    ltile = bt * length
    lane_rot = (ltile % 128) == 0           # pltpu.roll path needs a lane-aligned tile

    # Packed batch-boundary masks (row 0: zero where l == 0; row 1: zero where
    # l == length-1), shared by every conv layer.  One DMA stream.
    edge_l = edges_ref[0:1, :]
    edge_r = edges_ref[1:2, :]

    def shift(v, s):
        # +-1 neighbour shift along lanes; wrapped lanes are zeroed by the edge masks
        # (every tile contains whole batch elements, so wrap never mixes signals).
        if lane_rot:
            return pltpu.roll(v, s % ltile, axis=1)   # XLU rotate (free slot)
        return jnp.roll(v, s, axis=1)                 # fallback for odd tile widths

    def conv_k3(h, w_ref, b_ref):
        # Conv1d(k=3, s=1, p=1) as ONE MXU matmul: the three lane-shifted taps are
        # written into a persistent VMEM scratch (no per-layer concatenate copies).
        c = h.shape[0]
        taps_ref[0:c, :] = shift(h, 1) * edge_l           # h[:, l-1], zeroed at l == 0
        taps_ref[c:2 * c, :] = h
        taps_ref[2 * c:3 * c, :] = shift(h, -1) * edge_r  # h[:, l+1], zeroed at l == L-1
        return jnp.dot(_mxu(w_ref[...]), _mxu(taps_ref[0:3 * c, :]),
                       preferred_element_type=jnp.float32) + b_ref[...]

    x = x_ref[...]                                        # (C_in, bt*length)
    if x_ref.shape[0] == 1:
        # num_channels == 1: VPU broadcast MAC instead of a nearly-empty MXU matmul.
        xl = shift(x, 1) * edge_l
        xr = shift(x, -1) * edge_r
        h = (w1_ref[:, 0:1] * xl + w1_ref[:, 1:2] * x + w1_ref[:, 2:3] * xr
             + b1_ref[...])
    else:
        h = conv_k3(x, w1_ref, b1_ref)
    h = _leaky(h)
    h = _leaky(conv_k3(h, w2_ref, b2_ref))                # contraction depth 3*hidden
    h = _leaky(conv_k3(h, w3_ref, b3_ref))                # (hidden, bt*length)

    # Regroup lane-concatenated batches into token rows (bt*hidden, length) through a
    # persistent scratch (sublane-aligned static stores; no concatenate allocations).
    # TODO(synk): switch to a single pltpu.einshape "h(bl)->(bh)l" grouped reshape once
    # that lowering is verified on all target generations.
    for b in range(bt):
        ht_ref[b * hidden:(b + 1) * hidden, :] = h[:, b * length:(b + 1) * length]

    # fc_layers over all bt*hidden token rows, then the fused lane-padded heads
    # [means | log_vars | weight-logits | 0] in one 128-wide matmul.
    hf = _leaky(jnp.dot(_mxu(ht_ref[...]), _mxu(wfc_ref[...]),
                        preferred_element_type=jnp.float32) + bfc_ref[...])
    heads = (jnp.dot(_mxu(hf), _mxu(wh_ref[...]),
                     preferred_element_type=jnp.float32) + bh_ref[...])   # (bt*hidden, p)

    # torch.softmax(..., dim=1): softmax over the hidden/channel axis within each batch
    # element, applied to the weight-logit lanes only.  Vectorized over all bt batch
    # elements at once (single sublane reduction); exact division keeps the 2e-3 check.
    heads3 = heads.reshape(bt, hidden, p)                 # leading-dim split: layout no-op
    mx = jnp.max(heads3, axis=1, keepdims=True)
    ex = jnp.exp(heads3 - mx)
    sm = ex / jnp.sum(ex, axis=1, keepdims=True)
    col = lax.broadcasted_iota(jnp.int32, (1, 1, p), 2)
    is_weight_col = (col >= 2 * lk) & (col < 2 * lk + k)
    out_ref[...] = jnp.where(is_weight_col, sm, heads3)   # (bt, hidden, p), lane-dense


def encoder_forward(y, params, *, latent_dim, num_components):
    y = jnp.asarray(y, jnp.float32)
    B, C_in, L = y.shape
    H = params["w1"].shape[0]
    K = num_components
    LK = latent_dim * K
    P = _round_up(2 * LK + K, 128)                        # lane-dense fused output width

    # Conv weights with the 3 taps stacked along the contraction axis: (H, 3*C).
    def stack_taps(w):
        return jnp.concatenate([w[:, :, 0], w[:, :, 1], w[:, :, 2]], axis=1)

    w1s = stack_taps(params["w1"])                        # (H, 3*C_in)
    w2s = stack_taps(params["w2"])                        # (H, 3*H)
    w3s = stack_taps(params["w3"])                        # (H, 3*H)
    b1 = params["b1"].reshape(H, 1)
    b2 = params["b2"].reshape(H, 1)
    b3 = params["b3"].reshape(H, 1)
    wfc_t = params["wfc"].T                               # (L, H); needs signal_dim == hidden_dim
    bfc = params["bfc"].reshape(1, H)

    # Fused, lane-padded head weights: [means | log_vars | weights | 0-pad] -> (H, P).
    wh = jnp.zeros((H, P), jnp.float32)
    wh = wh.at[:, :LK].set(params["wm"].T)
    wh = wh.at[:, LK:2 * LK].set(params["wv"].T)
    wh = wh.at[:, 2 * LK:2 * LK + K].set(params["ww"].T)
    bh = jnp.zeros((1, P), jnp.float32)
    bh = bh.at[0, :LK].set(params["bm"])
    bh = bh.at[0, LK:2 * LK].set(params["bv"])
    bh = bh.at[0, 2 * LK:2 * LK + K].set(params["bw"])

    if MXU_DTYPE != jnp.float32:
        # Pre-cast MXU weight operands in the wrapper (v6e/v7x bf16 path); biases stay f32.
        w1s, w2s, w3s, wfc_t, wh = (a.astype(MXU_DTYPE) for a in (w1s, w2s, w3s, wfc_t, wh))

    weight_args = (w1s, b1, w2s, b2, w3s, b3, wfc_t, bfc, wh, bh)
    weight_bytes = sum(int(np.prod(a.shape)) * a.dtype.itemsize for a in weight_args)

    bt, vmem_limit = _choose_batch_tile(B, L, H, C_in, P, weight_bytes)
    n_steps = B // bt
    Ltile = bt * L

    # Batch concatenated along the lane axis: (C_in, B*L).  No channel zero padding.
    x_lanes = jnp.transpose(y, (1, 0, 2)).reshape(C_in, B * L)

    # Per-position edge masks packed into ONE (2, B*L) input (single DMA stream),
    # computed once and reused by every conv layer.
    l_idx = jnp.tile(jnp.arange(L, dtype=jnp.int32), B).reshape(1, B * L)
    edges = jnp.concatenate([(l_idx != 0).astype(jnp.float32),
                             (l_idx != L - 1).astype(jnp.float32)], axis=0)

    in_specs = [pl.BlockSpec((C_in, Ltile), lambda i: (0, i)),
                pl.BlockSpec((2, Ltile), lambda i: (0, i))]
    # Weights/biases: whole-array blocks with a constant index_map (never re-fetched).
    # They are KB-scale here, so default double-buffering costs no meaningful VMEM.
    in_specs += [pl.BlockSpec(a.shape, lambda i: (0, 0)) for a in weight_args]

    out_spec = pl.BlockSpec((bt, H, P), lambda i: (i, 0, 0))
    out_shape = jax.ShapeDtypeStruct((B, H, P), jnp.float32)

    kernel = functools.partial(encoder_kernel, bt=bt, length=L, lk=LK, k=K)

    fused = pl.pallas_call(
        kernel,
        grid=(n_steps,),
        in_specs=in_specs,
        out_specs=out_spec,
        out_shape=out_shape,
        scratch_shapes=[pltpu.VMEM((3 * max(H, C_in), Ltile), jnp.float32),  # conv taps
                        pltpu.VMEM((bt * H, L), jnp.float32)],               # regroup
        compiler_params=pltpu.CompilerParams(
            dimension_semantics=("parallel",),          # independent batch tiles
            vmem_limit_bytes=int(vmem_limit)),
    )(x_lanes, edges, *weight_args)

    means = fused[:, :, :LK].reshape(B * H, K, latent_dim)      # == torch .view(-1, K, latent)
    log_vars = fused[:, :, LK:2 * LK].reshape(B * H, K, latent_dim)
    weights = fused[:, :, 2 * LK:2 * LK + K]                    # already softmaxed (dim=1)
    return means, log_vars, weights


# ---------------- pure-JAX reference (for correctness check) ----------------

def _conv1d_ref(x, w, b):
    # x: (B, C, L), w: (O, C, 3), b: (O,). PyTorch Conv1d semantics (k=3, s=1, p=1).
    L = x.shape[-1]
    xp = jnp.pad(x, ((0, 0), (0, 0), (1, 1)))
    out = sum(jnp.einsum("oc,bcl->bol", w[:, :, k], xp[:, :, k:k + L],
                         precision=lax.Precision.HIGHEST) for k in range(3))
    return out + b.reshape(1, -1, 1)


def encoder_ref(y, params, *, latent_dim, num_components):
    leaky = lambda v: jnp.where(v > 0, v, NEG_SLOPE * v)
    h = leaky(_conv1d_ref(y, params["w1"], params["b1"]))
    h = leaky(_conv1d_ref(h, params["w2"], params["b2"]))
    h = leaky(_conv1d_ref(h, params["w3"], params["b3"]))
    h = leaky(jnp.einsum("bci,ji->bcj", h, params["wfc"], precision=lax.Precision.HIGHEST)
              + params["bfc"])
    means = jnp.einsum("bcj,mj->bcm", h, params["wm"], precision=lax.Precision.HIGHEST) + params["bm"]
    logv = jnp.einsum("bcj,mj->bcm", h, params["wv"], precision=lax.Precision.HIGHEST) + params["bv"]
    wl = jnp.einsum("bcj,kj->bck", h, params["ww"], precision=lax.Precision.HIGHEST) + params["bw"]
    weights = jax.nn.softmax(wl, axis=1)
    B, H = h.shape[0], h.shape[1]
    return (means.reshape(B * H, num_components, latent_dim),
            logv.reshape(B * H, num_components, latent_dim),
            weights)


# TODO(synk): `define_and_sample_gmm` (Categorical / MultivariateNormal / MixtureSameFamily
# sampling) is a distribution-sampling utility, not part of forward(); left out of the kernel.


if __name__ == "__main__":
    # Small shapes consistent with the module. forward() requires signal_dim == hidden_dim.
    # B=4 with L=32 gives a lane-dense (bt*L = 128) tile, exercising the pltpu.roll /
    # scratch / vectorized-softmax fast path that is validated against the reference.
    B = 4
    num_channels = 1
    hidden_dim = 32
    signal_dim = 32
    latent_dim = 8
    num_components = 4

    key = jax.random.PRNGKey(0)
    ks = jax.random.split(key, 16)
    scale = 0.1
    H, LK, K = hidden_dim, latent_dim * num_components, num_components

    params = {
        "w1": scale * jax.random.normal(ks[0], (H, num_channels, 3), jnp.float32),
        "b1": scale * jax.random.normal(ks[1], (H,), jnp.float32),
        "w2": scale * jax.random.normal(ks[2], (H, H, 3), jnp.float32),
        "b2": scale * jax.random.normal(ks[3], (H,), jnp.float32),
        "w3": scale * jax.random.normal(ks[4], (H, H, 3), jnp.float32),
        "b3": scale * jax.random.normal(ks[5], (H,), jnp.float32),
        "wfc": scale * jax.random.normal(ks[6], (H, signal_dim), jnp.float32),
        "bfc": scale * jax.random.normal(ks[7], (H,), jnp.float32),
        "wm": scale * jax.random.normal(ks[8], (LK, H), jnp.float32),
        "bm": scale * jax.random.normal(ks[9], (LK,), jnp.float32),
        "wv": scale * jax.random.normal(ks[10], (LK, H), jnp.float32),
        "bv": scale * jax.random.normal(ks[11], (LK,), jnp.float32),
        "ww": scale * jax.random.normal(ks[12], (K, H), jnp.float32),
        "bw": scale * jax.random.normal(ks[13], (K,), jnp.float32),
    }

    y = jax.random.normal(ks[14], (B, num_channels, signal_dim), jnp.float32)

    means, log_vars, weights = encoder_forward(
        y, params, latent_dim=latent_dim, num_components=num_components)
    jax.block_until_ready((means, log_vars, weights))

    r_means, r_log_vars, r_weights = encoder_ref(
        y, params, latent_dim=latent_dim, num_components=num_components)

    np.testing.assert_allclose(np.asarray(means), np.asarray(r_means), rtol=2e-3, atol=2e-3)
    np.testing.assert_allclose(np.asarray(log_vars), np.asarray(r_log_vars), rtol=2e-3, atol=2e-3)
    np.testing.assert_allclose(np.asarray(weights), np.asarray(r_weights), rtol=2e-3, atol=2e-3)

    assert means.shape == (B * hidden_dim, num_components, latent_dim)
    assert log_vars.shape == (B * hidden_dim, num_components, latent_dim)
    assert weights.shape == (B, hidden_dim, num_components)

    print("KERNEL_OK")
</pallas_src>

<mosaic_0001>
module attributes {stable_mosaic.version = 11 : i64} {
  func.func @encoder_kernel(%arg0: i32, %arg1: memref<1x128xf32, #tpu.memory_space<vmem>>, %arg2: memref<2x128xf32, #tpu.memory_space<vmem>>, %arg3: memref<32x3xf32, #tpu.memory_space<vmem>>, %arg4: memref<32x1xf32, #tpu.memory_space<vmem>>, %arg5: memref<32x96xf32, #tpu.memory_space<vmem>>, %arg6: memref<32x1xf32, #tpu.memory_space<vmem>>, %arg7: memref<32x96xf32, #tpu.memory_space<vmem>>, %arg8: memref<32x1xf32, #tpu.memory_space<vmem>>, %arg9: memref<32x32xf32, #tpu.memory_space<vmem>>, %arg10: memref<1x32xf32, #tpu.memory_space<vmem>>, %arg11: memref<32x128xf32, #tpu.memory_space<vmem>>, %arg12: memref<1x128xf32, #tpu.memory_space<vmem>>, %arg13: memref<4x32x128xf32, #tpu.memory_space<vmem>>, %arg14: memref<96x128xf32, #tpu.memory_space<vmem>>, %arg15: memref<128x32xf32, #tpu.memory_space<vmem>>) attributes {dimension_semantics = [#tpu.dimension_semantics<parallel>], iteration_bounds = array<i64: 1>, scalar_prefetch = 0 : i64, scratch_operands = 2 : i64, tpu.core_type = #tpu.core_type<tc>, window_params = [{transform_indices = @transform_0, window_bounds = array<i64: 1, 128>}, {transform_indices = @transform_1, window_bounds = array<i64: 2, 128>}, {pipeline_mode = #tpu.pipeline_mode<synchronous>, transform_indices = @transform_2, window_bounds = array<i64: 32, 3>}, {pipeline_mode = #tpu.pipeline_mode<synchronous>, transform_indices = @transform_3, window_bounds = array<i64: 32, 1>}, {pipeline_mode = #tpu.pipeline_mode<synchronous>, transform_indices = @transform_4, window_bounds = array<i64: 32, 96>}, {pipeline_mode = #tpu.pipeline_mode<synchronous>, transform_indices = @transform_5, window_bounds = array<i64: 32, 1>}, {pipeline_mode = #tpu.pipeline_mode<synchronous>, transform_indices = @transform_6, window_bounds = array<i64: 32, 96>}, {pipeline_mode = #tpu.pipeline_mode<synchronous>, transform_indices = @transform_7, window_bounds = array<i64: 32, 1>}, {pipeline_mode = #tpu.pipeline_mode<synchronous>, transform_indices = @transform_8, window_bounds = array<i64: 32, 32>}, {pipeline_mode = #tpu.pipeline_mode<synchronous>, transform_indices = @transform_9, window_bounds = array<i64: 1, 32>}, {pipeline_mode = #tpu.pipeline_mode<synchronous>, transform_indices = @transform_10, window_bounds = array<i64: 32, 128>}, {pipeline_mode = #tpu.pipeline_mode<synchronous>, transform_indices = @transform_11, window_bounds = array<i64: 1, 128>}, {transform_indices = @transform_12, window_bounds = array<i64: 4, 32, 128>}]} {
    %c0 = arith.constant 0 : index
    %c0_0 = arith.constant 0 : index
    %0 = vector.load %arg2[%c0, %c0_0] : memref<2x128xf32, #tpu.memory_space<vmem>>, vector<1x128xf32>
    %c1 = arith.constant 1 : index
    %c0_1 = arith.constant 0 : index
    %1 = vector.load %arg2[%c1, %c0_1] : memref<2x128xf32, #tpu.memory_space<vmem>>, vector<1x128xf32>
    %c0_2 = arith.constant 0 : index
    %c0_3 = arith.constant 0 : index
    %2 = vector.load %arg1[%c0_2, %c0_3] : memref<1x128xf32, #tpu.memory_space<vmem>>, vector<1x128xf32>
    %c1_i32 = arith.constant 1 : i32
    %3 = tpu.dynamic_rotate %2 by %c1_i32 dim 1 : vector<1x128xf32>, i32 -> vector<1x128xf32>
    %4 = arith.mulf %3, %0 : vector<1x128xf32>
    %c127_i32 = arith.constant 127 : i32
    %5 = tpu.dynamic_rotate %2 by %c127_i32 dim 1 : vector<1x128xf32>, i32 -> vector<1x128xf32>
    %6 = arith.mulf %5, %1 : vector<1x128xf32>
    %c0_4 = arith.constant 0 : index
    %c0_5 = arith.constant 0 : index
    %7 = vector.load %arg3[%c0_4, %c0_5] : memref<32x3xf32, #tpu.memory_space<vmem>>, vector<32x1xf32>
    %8 = vector.broadcast %7 : vector<32x1xf32> to vector<32x128xf32>
    %9 = vector.broadcast %4 : vector<1x128xf32> to vector<32x128xf32>
    %10 = arith.mulf %8, %9 : vector<32x128xf32>
    %c0_6 = arith.constant 0 : index
    %c1_7 = arith.constant 1 : index
    %11 = vector.load %arg3[%c0_6, %c1_7] : memref<32x3xf32, #tpu.memory_space<vmem>>, vector<32x1xf32>
    %12 = vector.broadcast %11 : vector<32x1xf32> to vector<32x128xf32>
    %13 = vector.broadcast %2 : vector<1x128xf32> to vector<32x128xf32>
    %14 = arith.mulf %12, %13 : vector<32x128xf32>
    %15 = arith.addf %10, %14 : vector<32x128xf32>
    %c0_8 = arith.constant 0 : index
    %c2 = arith.constant 2 : index
    %16 = vector.load %arg3[%c0_8, %c2] : memref<32x3xf32, #tpu.memory_space<vmem>>, vector<32x1xf32>
    %17 = vector.broadcast %16 : vector<32x1xf32> to vector<32x128xf32>
    %18 = vector.broadcast %6 : vector<1x128xf32> to vector<32x128xf32>
    %19 = arith.mulf %17, %18 : vector<32x128xf32>
    %20 = arith.addf %15, %19 : vector<32x128xf32>
    %c0_9 = arith.constant 0 : index
    %c0_10 = arith.constant 0 : index
    %21 = vector.load %arg4[%c0_9, %c0_10] : memref<32x1xf32, #tpu.memory_space<vmem>>, vector<32x1xf32>
    %22 = vector.broadcast %21 : vector<32x1xf32> to vector<32x128xf32>
    %23 = arith.addf %20, %22 : vector<32x128xf32>
    %cst = arith.constant 0.000000e+00 : f32
    %24 = vector.broadcast %cst : f32 to vector<32x128xf32>
    %25 = arith.cmpf ogt, %23, %24 : vector<32x128xf32>
    %cst_11 = arith.constant 2.000000e-01 : f32
    %26 = vector.broadcast %cst_11 : f32 to vector<32x128xf32>
    %27 = arith.mulf %26, %23 : vector<32x128xf32>
    %28 = arith.select %25, %23, %27 : vector<32x128xi1>, vector<32x128xf32>
    %c1_i32_12 = arith.constant 1 : i32
    %29 = tpu.dynamic_rotate %28 by %c1_i32_12 dim 1 : vector<32x128xf32>, i32 -> vector<32x128xf32>
    %30 = vector.broadcast %0 : vector<1x128xf32> to vector<32x128xf32>
    %31 = arith.mulf %29, %30 : vector<32x128xf32>
    %c0_13 = arith.constant 0 : index
    %c0_14 = arith.constant 0 : index
    %32 = vector.load %arg14[%c0_13, %c0_14] : memref<96x128xf32, #tpu.memory_space<vmem>>, vector<32x128xf32>
    tpu.vector_store %arg14[%c0_13, %c0_14], %31 {strides = array<i32>} : memref<96x128xf32, #tpu.memory_space<vmem>>, vector<32x128xf32>,
    %c32 = arith.constant 32 : index
    %c0_15 = arith.constant 0 : index
    %33 = vector.load %arg14[%c32, %c0_15] : memref<96x128xf32, #tpu.memory_space<vmem>>, vector<32x128xf32>
    tpu.vector_store %arg14[%c32, %c0_15], %28 {strides = array<i32>} : memref<96x128xf32, #tpu.memory_space<vmem>>, vector<32x128xf32>,
    %c127_i32_16 = arith.constant 127 : i32
    %34 = tpu.dynamic_rotate %28 by %c127_i32_16 dim 1 : vector<32x128xf32>, i32 -> vector<32x128xf32>
    %35 = vector.broadcast %1 : vector<1x128xf32> to vector<32x128xf32>
    %36 = arith.mulf %34, %35 : vector<32x128xf32>
    %c64 = arith.constant 64 : index
    %c0_17 = arith.constant 0 : index
    %37 = vector.load %arg14[%c64, %c0_17] : memref<96x128xf32, #tpu.memory_space<vmem>>, vector<32x128xf32>
    tpu.vector_store %arg14[%c64, %c0_17], %36 {strides = array<i32>} : memref<96x128xf32, #tpu.memory_space<vmem>>, vector<32x128xf32>,
    %c0_18 = arith.constant 0 : index
    %c0_19 = arith.constant 0 : index
    %38 = vector.load %arg5[%c0_18, %c0_19] : memref<32x96xf32, #tpu.memory_space<vmem>>, vector<32x96xf32>
    %c0_20 = arith.constant 0 : index
    %c0_21 = arith.constant 0 : index
    %39 = vector.load %arg14[%c0_20, %c0_21] : memref<96x128xf32, #tpu.memory_space<vmem>>, vector<96x128xf32>
    %cst_22 = arith.constant dense<0.000000e+00> : vector<32x128xf32>
    %40 = tpu.matmul %38, %39, %cst_22 {dimension_numbers = #tpu.dot_dimension_numbers<[1], [0], [0], [1], [0, 0, 1, 1], [], []>} : vector<32x96xf32>, vector<96x128xf32>, vector<32x128xf32> -> vector<32x128xf32>
    %c0_23 = arith.constant 0 : index
    %c0_24 = arith.constant 0 : index
    %41 = vector.load %arg6[%c0_23, %c0_24] : memref<32x1xf32, #tpu.memory_space<vmem>>, vector<32x1xf32>
    %42 = vector.broadcast %41 : vector<32x1xf32> to vector<32x128xf32>
    %43 = arith.addf %40, %42 : vector<32x128xf32>
    %cst_25 = arith.constant 0.000000e+00 : f32
    %44 = vector.broadcast %cst_25 : f32 to vector<32x128xf32>
    %45 = arith.cmpf ogt, %43, %44 : vector<32x128xf32>
    %cst_26 = arith.constant 2.000000e-01 : f32
    %46 = vector.broadcast %cst_26 : f32 to vector<32x128xf32>
    %47 = arith.mulf %46, %43 : vector<32x128xf32>
    %48 = arith.select %45, %43, %47 : vector<32x128xi1>, vector<32x128xf32>
    %c1_i32_27 = arith.constant 1 : i32
    %49 = tpu.dynamic_rotate %48 by %c1_i32_27 dim 1 : vector<32x128xf32>, i32 -> vector<32x128xf32>
    %50 = vector.broadcast %0 : vector<1x128xf32> to vector<32x128xf32>
    %51 = arith.mulf %49, %50 : vector<32x128xf32>
    %c0_28 = arith.constant 0 : index
    %c0_29 = arith.constant 0 : index
    %52 = vector.load %arg14[%c0_28, %c0_29] : memref<96x128xf32, #tpu.memory_space<vmem>>, vector<32x128xf32>
    tpu.vector_store %arg14[%c0_28, %c0_29], %51 {strides = array<i32>} : memref<96x128xf32, #tpu.memory_space<vmem>>, vector<32x128xf32>,
    %c32_30 = arith.constant 32 : index
    %c0_31 = arith.constant 0 : index
    %53 = vector.load %arg14[%c32_30, %c0_31] : memref<96x128xf32, #tpu.memory_space<vmem>>, vector<32x128xf32>
    tpu.vector_store %arg14[%c32_30, %c0_31], %48 {strides = array<i32>} : memref<96x128xf32, #tpu.memory_space<vmem>>, vector<32x128xf32>,
    %c127_i32_32 = arith.constant 127 : i32
    %54 = tpu.dynamic_rotate %48 by %c127_i32_32 dim 1 : vector<32x128xf32>, i32 -> vector<32x128xf32>
    %55 = vector.broadcast %1 : vector<1x128xf32> to vector<32x128xf32>
    %56 = arith.mulf %54, %55 : vector<32x128xf32>
    %c64_33 = arith.constant 64 : index
    %c0_34 = arith.constant 0 : index
    %57 = vector.load %arg14[%c64_33, %c0_34] : memref<96x128xf32, #tpu.memory_space<vmem>>, vector<32x128xf32>
    tpu.vector_store %arg14[%c64_33, %c0_34], %56 {strides = array<i32>} : memref<96x128xf32, #tpu.memory_space<vmem>>, vector<32x128xf32>,
    %c0_35 = arith.constant 0 : index
    %c0_36 = arith.constant 0 : index
    %58 = vector.load %arg7[%c0_35, %c0_36] : memref<32x96xf32, #tpu.memory_space<vmem>>, vector<32x96xf32>
    %c0_37 = arith.constant 0 : index
    %c0_38 = arith.constant 0 : index
    %59 = vector.load %arg14[%c0_37, %c0_38] : memref<96x128xf32, #tpu.memory_space<vmem>>, vector<96x128xf32>
    %cst_39 = arith.constant dense<0.000000e+00> : vector<32x128xf32>
    %60 = tpu.matmul %58, %59, %cst_39 {dimension_numbers = #tpu.dot_dimension_numbers<[1], [0], [0], [1], [0, 0, 1, 1], [], []>} : vector<32x96xf32>, vector<96x128xf32>, vector<32x128xf32> -> vector<32x128xf32>
    %c0_40 = arith.constant 0 : index
    %c0_41 = arith.constant 0 : index
    %61 = vector.load %arg8[%c0_40, %c0_41] : memref<32x1xf32, #tpu.memory_space<vmem>>, vector<32x1xf32>
    %62 = vector.broadcast %61 : vector<32x1xf32> to vector<32x128xf32>
    %63 = arith.addf %60, %62 : vector<32x128xf32>
    %cst_42 = arith.constant 0.000000e+00 : f32
    %64 = vector.broadcast %cst_42 : f32 to vector<32x128xf32>
    %65 = arith.cmpf ogt, %63, %64 : vector<32x128xf32>
    %cst_43 = arith.constant 2.000000e-01 : f32
    %66 = vector.broadcast %cst_43 : f32 to vector<32x128xf32>
    %67 = arith.mulf %66, %63 : vector<32x128xf32>
    %68 = arith.select %65, %63, %67 : vector<32x128xi1>, vector<32x128xf32>
    %69 = vector.extract_strided_slice %68 {offsets = [0, 0], sizes = [32, 32], strides = [1, 1]} : vector<32x128xf32> to vector<32x32xf32>
    %c0_44 = arith.constant 0 : index
    %c0_45 = arith.constant 0 : index
    %70 = vector.load %arg15[%c0_44, %c0_45] : memref<128x32xf32, #tpu.memory_space<vmem>>, vector<32x32xf32>
    tpu.vector_store %arg15[%c0_44, %c0_45], %69 {strides = array<i32>} : memref<128x32xf32, #tpu.memory_space<vmem>>, vector<32x32xf32>,
    %71 = vector.extract_strided_slice %68 {offsets = [0, 32], sizes = [32, 32], strides = [1, 1]} : vector<32x128xf32> to vector<32x32xf32>
    %c32_46 = arith.constant 32 : index
    %c0_47 = arith.constant 0 : index
    %72 = vector.load %arg15[%c32_46, %c0_47] : memref<128x32xf32, #tpu.memory_space<vmem>>, vector<32x32xf32>
    tpu.vector_store %arg15[%c32_46, %c0_47], %71 {strides = array<i32>} : memref<128x32xf32, #tpu.memory_space<vmem>>, vector<32x32xf32>,
    %73 = vector.extract_strided_slice %68 {offsets = [0, 64], sizes = [32, 32], strides = [1, 1]} : vector<32x128xf32> to vector<32x32xf32>
    %c64_48 = arith.constant 64 : index
    %c0_49 = arith.constant 0 : index
    %74 = vector.load %arg15[%c64_48, %c0_49] : memref<128x32xf32, #tpu.memory_space<vmem>>, vector<32x32xf32>
    tpu.vector_store %arg15[%c64_48, %c0_49], %73 {strides = array<i32>} : memref<128x32xf32, #tpu.memory_space<vmem>>, vector<32x32xf32>,
    %75 = vector.extract_strided_slice %68 {offsets = [0, 96], sizes = [32, 32], strides = [1, 1]} : vector<32x128xf32> to vector<32x32xf32>
    %c96 = arith.constant 96 : index
    %c0_50 = arith.constant 0 : index
    %76 = vector.load %arg15[%c96, %c0_50] : memref<128x32xf32, #tpu.memory_space<vmem>>, vector<32x32xf32>
    tpu.vector_store %arg15[%c96, %c0_50], %75 {strides = array<i32>} : memref<128x32xf32, #tpu.memory_space<vmem>>, vector<32x32xf32>,
    %c0_51 = arith.constant 0 : index
    %c0_52 = arith.constant 0 : index
    %77 = vector.load %arg15[%c0_51, %c0_52] : memref<128x32xf32, #tpu.memory_space<vmem>>, vector<128x32xf32>
    %c0_53 = arith.constant 0 : index
    %c0_54 = arith.constant 0 : index
    %78 = vector.load %arg9[%c0_53, %c0_54] : memref<32x32xf32, #tpu.memory_space<vmem>>, vector<32x32xf32>
    %cst_55 = arith.constant dense<0.000000e+00> : vector<128x32xf32>
    %79 = tpu.matmul %77, %78, %cst_55 {dimension_numbers = #tpu.dot_dimension_numbers<[1], [0], [0], [1], [0, 0, 1, 1], [], []>} : vector<128x32xf32>, vector<32x32xf32>, vector<128x32xf32> -> vector<128x32xf32>
    %c0_56 = arith.constant 0 : index
    %c0_57 = arith.constant 0 : index
    %80 = vector.load %arg10[%c0_56, %c0_57] : memref<1x32xf32, #tpu.memory_space<vmem>>, vector<1x32xf32>
    %81 = vector.broadcast %80 : vector<1x32xf32> to vector<128x32xf32>
    %82 = arith.addf %79, %81 : vector<128x32xf32>
    %cst_58 = arith.constant 0.000000e+00 : f32
    %83 = vector.broadcast %cst_58 : f32 to vector<128x32xf32>
    %84 = arith.cmpf ogt, %82, %83 : vector<128x32xf32>
    %cst_59 = arith.constant 2.000000e-01 : f32
    %85 = vector.broadcast %cst_59 : f32 to vector<128x32xf32>
    %86 = arith.mulf %85, %82 : vector<128x32xf32>
    %87 = arith.select %84, %82, %86 : vector<128x32xi1>, vector<128x32xf32>
    %c0_60 = arith.constant 0 : index
    %c0_61 = arith.constant 0 : index
    %88 = vector.load %arg11[%c0_60, %c0_61] : memref<32x128xf32, #tpu.memory_space<vmem>>, vector<32x128xf32>
    %cst_62 = arith.constant dense<0.000000e+00> : vector<128x128xf32>
    %89 = tpu.matmul %87, %88, %cst_62 {dimension_numbers = #tpu.dot_dimension_numbers<[1], [0], [0], [1], [0, 0, 1, 1], [], []>} : vector<128x32xf32>, vector<32x128xf32>, vector<128x128xf32> -> vector<128x128xf32>
    %c0_63 = arith.constant 0 : index
    %c0_64 = arith.constant 0 : index
    %90 = vector.load %arg12[%c0_63, %c0_64] : memref<1x128xf32, #tpu.memory_space<vmem>>, vector<1x128xf32>
    %91 = vector.broadcast %90 : vector<1x128xf32> to vector<128x128xf32>
    %92 = arith.addf %89, %91 : vector<128x128xf32>
    %93 = vector.shape_cast %92 : vector<128x128xf32> to vector<4x32x128xf32>
    %cst_65 = arith.constant dense<0xFF800000> : vector<4x128xf32>
    %94 = vector.multi_reduction <maximumf>, %93, %cst_65 [1] : vector<4x32x128xf32> to vector<4x128xf32>
    %95 = vector.shape_cast %94 : vector<4x128xf32> to vector<4x1x128xf32>
    %96 = vector.broadcast %95 : vector<4x1x128xf32> to vector<4x32x128xf32>
    %97 = arith.subf %93, %96 : vector<4x32x128xf32>
    %98 = math.exp %97 : vector<4x32x128xf32>
    %cst_66 = arith.constant dense<0.000000e+00> : vector<4x128xf32>
    %99 = vector.multi_reduction <add>, %98, %cst_66 [1] : vector<4x32x128xf32> to vector<4x128xf32>
    %100 = vector.shape_cast %99 : vector<4x128xf32> to vector<4x1x128xf32>
    %101 = vector.broadcast %100 : vector<4x1x128xf32> to vector<4x32x128xf32>
    %102 = arith.divf %98, %101 : vector<4x32x128xf32>
    %103 = tpu.iota {dimensions = array<i32: 2>} : vector<1x1x128xi32>
    %c64_i32 = arith.constant 64 : i32
    %104 = vector.broadcast %c64_i32 : i32 to vector<1x1x128xi32>
    %105 = arith.cmpi sge, %103, %104 : vector<1x1x128xi32>
    %c68_i32 = arith.constant 68 : i32
    %106 = vector.broadcast %c68_i32 : i32 to vector<1x1x128xi32>
    %107 = arith.cmpi slt, %103, %106 : vector<1x1x128xi32>
    %108 = arith.andi %105, %107 : vector<1x1x128xi1>
    %109 = vector.shape_cast %108 : vector<1x1x128xi1> to vector<1x1x128xi1>
    %110 = vector.broadcast %109 : vector<1x1x128xi1> to vector<4x32x128xi1>
    %111 = arith.select %110, %102, %93 : vector<4x32x128xi1>, vector<4x32x128xf32>
    %c0_67 = arith.constant 0 : index
    %c0_68 = arith.constant 0 : index
    %c0_69 = arith.constant 0 : index
    %112 = vector.load %arg13[%c0_67, %c0_68, %c0_69] : memref<4x32x128xf32, #tpu.memory_space<vmem>>, vector<4x32x128xf32>
    tpu.vector_store %arg13[%c0_67, %c0_68, %c0_69], %111 {strides = array<i32>} : memref<4x32x128xf32, #tpu.memory_space<vmem>>, vector<4x32x128xf32>,
    return
  }
  func.func @transform_0(%arg0: i32) -> (i32, i32) {
    %c0_i32 = arith.constant 0 : i32
    %c0_i32_0 = arith.constant 0 : i32
    return %c0_i32, %arg0 : i32, i32
  }
  func.func @transform_1(%arg0: i32) -> (i32, i32) {
    %c0_i32 = arith.constant 0 : i32
    %c0_i32_0 = arith.constant 0 : i32
    return %c0_i32, %arg0 : i32, i32
  }
  func.func @transform_2(%arg0: i32) -> (i32, i32) {
    %c0_i32 = arith.constant 0 : i32
    %c0_i32_0 = arith.constant 0 : i32
    %c0_i32_1 = arith.constant 0 : i32
    return %c0_i32, %c0_i32_0 : i32, i32
  }
  func.func @transform_3(%arg0: i32) -> (i32, i32) {
    %c0_i32 = arith.constant 0 : i32
    %c0_i32_0 = arith.constant 0 : i32
    %c0_i32_1 = arith.constant 0 : i32
    return %c0_i32, %c0_i32_0 : i32, i32
  }
  func.func @transform_4(%arg0: i32) -> (i32, i32) {
    %c0_i32 = arith.constant 0 : i32
    %c0_i32_0 = arith.constant 0 : i32
    %c0_i32_1 = arith.constant 0 : i32
    return %c0_i32, %c0_i32_0 : i32, i32
  }
  func.func @transform_5(%arg0: i32) -> (i32, i32) {
    %c0_i32 = arith.constant 0 : i32
    %c0_i32_0 = arith.constant 0 : i32
    %c0_i32_1 = arith.constant 0 : i32
    return %c0_i32, %c0_i32_0 : i32, i32
  }
  func.func @transform_6(%arg0: i32) -> (i32, i32) {
    %c0_i32 = arith.constant 0 : i32
    %c0_i32_0 = arith.constant 0 : i32
    %c0_i32_1 = arith.constant 0 : i32
    return %c0_i32, %c0_i32_0 : i32, i32
  }
  func.func @transform_7(%arg0: i32) -> (i32, i32) {
    %c0_i32 = arith.constant 0 : i32
    %c0_i32_0 = arith.constant 0 : i32
    %c0_i32_1 = arith.constant 0 : i32
    return %c0_i32, %c0_i32_0 : i32, i32
  }
  func.func @transform_8(%arg0: i32) -> (i32, i32) {
    %c0_i32 = arith.constant 0 : i32
    %c0_i32_0 = arith.constant 0 : i32
    %c0_i32_1 = arith.constant 0 : i32
    return %c0_i32, %c0_i32_0 : i32, i32
  }
  func.func @transform_9(%arg0: i32) -> (i32, i32) {
    %c0_i32 = arith.constant 0 : i32
    %c0_i32_0 = arith.constant 0 : i32
    %c0_i32_1 = arith.constant 0 : i32
    return %c0_i32, %c0_i32_0 : i32, i32
  }
  func.func @transform_10(%arg0: i32) -> (i32, i32) {
    %c0_i32 = arith.constant 0 : i32
    %c0_i32_0 = arith.constant 0 : i32
    %c0_i32_1 = arith.constant 0 : i32
    return %c0_i32, %c0_i32_0 : i32, i32
  }
  func.func @transform_11(%arg0: i32) -> (i32, i32) {
    %c0_i32 = arith.constant 0 : i32
    %c0_i32_0 = arith.constant 0 : i32
    %c0_i32_1 = arith.constant 0 : i32
    return %c0_i32, %c0_i32_0 : i32, i32
  }
  func.func @transform_12(%arg0: i32) -> (i32, i32, i32) {
    %c0_i32 = arith.constant 0 : i32
    %c0_i32_0 = arith.constant 0 : i32
    %c0_i32_1 = arith.constant 0 : i32
    return %arg0, %c0_i32, %c0_i32_0 : i32, i32, i32
  }
}

</mosaic_0001>

<bundles_post_ra>
// kernel: tpu_custom_call.1
= control target key start
LH: loop header
LB: loop body
LE: loop exit
PB: predicated region body
PF: predicated region fallthrough
CT: control target
= control target key end

     0   :  { %v1671_v1 = vmov 1   ;;  %v1672_v2 = vmov 0   ;;  %s2113_s0 = inlined_call_operand.vmem [shape: f32[1,128], index: 0, kind: input, shape index: {}]   ;;  %s2114_s1 = inlined_call_operand.vmem [shape: f32[2,128], index: 1, kind: input, shape index: {}]   ;;  %s2115_s2 = inlined_call_operand.vmem [shape: f32[32,3], index: 2, kind: input, shape index: {}]   ;;  %s2116_s3 = inlined_call_operand.vmem [shape: f32[32,1], index: 3, kind: input, shape index: {}]   ;;  %s2117_s4 = inlined_call_operand.vmem [shape: f32[32,96], index: 4, kind: input, shape index: {}]   ;;  %s2118_s5 = inlined_call_operand.vmem [shape: f32[32,1], index: 5, kind: input, shape index: {}]   ;;  %s2119_s6 = inlined_call_operand.vmem [shape: f32[32,96], index: 6, kind: input, shape index: {}]   ;;  %s2120_s7 = inlined_call_operand.vmem [shape: f32[32,1], index: 7, kind: input, shape index: {}]   ;;  %s2121_s8 = inlined_call_operand.vmem [shape: f32[32,32], index: 8, kind: input, shape index: {}]   ;;  %s2122_s9 = inlined_call_operand.vmem [shape: f32[1,32], index: 9, kind: input, shape index: {}]   ;;  %s2123_s10 = inlined_call_operand.vmem [shape: f32[32,128], index: 10, kind: input, shape index: {}]   ;;  %s2124_s11 = inlined_call_operand.vmem [shape: f32[1,128], index: 11, kind: input, shape index: {}]   ;;  %s2125_s12 = inlined_call_operand.hbm [shape: f32[4,32,128], index: 12, kind: output, shape index: {}]  }
   0x1   :  { %v51_v0 = vld [vmem:[%s2115_s2] sm:$0xff]  ;;  %1598 = vset.pattern.permute.xlu1 %v1671_v1  ;;  %1597 = vset.pattern.permute.xlu0 %v1672_v2  ;;  %v52_v3 = vld [vmem:[%s2115_s2 + $0x8] sm:$0xff] }
   0x2   :  { %84 = vperm.xlu1 %1598, %v51_v0   ;;  %57 = vperm.xlu0 %1597, %v51_v0  }
   0x3   :  { %17 = vsyncpa [#allocation5], 0  ;;  %v53_v4 = vld [vmem:[%s2115_s2 + $0x10] sm:$0xff]  ;;  %v1673_v5 = vmov 2   ;;  %v44_v6 = vld [vmem:[%s2113_s0] sm:$0x1]  ;;  %v75_v18 = vlaneseq }
   0x4   :  { %v54_v7 = vld [vmem:[%s2115_s2 + $0x18] sm:$0xff]  ;;  %s1674_s13 = smov 1   ;;  %v143_v8 = vld [vmem:[%s2116_s3 + $0x10] sm:$0xff]  ;;  %s1675_s0 = smov 127   ;;  %v141_v9 = vld [vmem:[%s2116_s3] sm:$0xff]  ;;  %vm265_vm4 = vcmask 785408  }
   0x5   :  { %v142_v10 = vld [vmem:[%s2116_s3 + $0x8] sm:$0xff]  ;;  %v144_v11 = vld [vmem:[%s2116_s3 + $0x18] sm:$0xff]  ;;  %v1779_v20 = vld [vmem:[%s2114_s1] sm:$0x1]  ;;  %v76_v21 = vshrl.u32 %v75_v18, 7  ;;  %vm560_vm10 = vcmask 261120  }
   0x6   :  { %88 = vperm.xlu1 %1598, %v52_v3   ;;  %62 = vperm.xlu0 %1597, %v52_v3   ;;  %v1789_v29 = vld [vmem:[%s2114_s1 + $0x1] sm:$0x1]  ;;  %s1678_s19 = smov 32  }
   0x7   :  { %v1783_v25 = vsub.s32 0, %v76_v21 }
   0x9   :  { %v103_v30 = vrot.slane %v44_v6, %v1783_v25 }
   0xa   :  { %1599 = vset.pattern.permute.xlu1 %v1673_v5  ;;  %67 = vperm.xlu0 %1597, %v53_v4  }
   0xb   :  { %118 = vperm.xlu1 %1599, %v52_v3  }
   0xe   :  { %1602 = vset.pattern.permute.xlu0 %v1671_v1 }
   0xf   :  { %45 = vrot.lane.b32.xlu1 %v44_v6, %s1674_s13  ;;  %96 = vperm.xlu0 %1602, %v54_v7  }
  0x10   :  { %1600 = vset.pattern.permute.xlu1 %v1672_v2 }
  0x13   :  { %72 = vperm.xlu1 %1600, %v54_v7   ;;  %1603 = vset.pattern.permute.xlu0 %v1673_v5 }
  0x14   :  { %114 = vperm.xlu0 %1603, %v51_v0  }
  0x17   :  { %1601 = vset.pattern.permute.xlu1 %v1671_v1 }
  0x18   :  { %92 = vperm.xlu1 %1601, %v53_v4   ;;  %126 = vperm.xlu0 %1603, %v54_v7  }
  0x1c   :  { %48 = vrot.lane.b32.xlu1 %v44_v6, %s1675_s0  ;;  %1606 = vset.pattern.permute.xlu0 %v1672_v2 }
  0x1d   :  { %1604 = vset.pattern.permute.xlu1 %v1673_v5  ;;  %157 = vperm.xlu0 %1606, %v143_v8  }
  0x20   :  { %122 = vperm.xlu1 %1604, %v53_v4  }
  0x24   :  { %1605 = vset.pattern.permute.xlu1 %v1672_v2 }
  0x25   :  { %147 = vperm.xlu1 %1605, %v141_v9  }
  0x29   :  { %152 = vperm.xlu1 %1605, %v142_v10   ;;  %v241_v10 = vld [vmem:[%s2118_s5] sm:$0xff] }
  0x2d   :  { %162 = vperm.xlu1 %1605, %v144_v11   ;;  %v225_v11 = vld [vmem:[%s2117_s4] sm:$0xff] }
  0x2e   :  { %1422 = vmatprep.mubr.msk.f32.mxu0 %vm265_vm4, %v225_v11 }
  0x81   :  { %v85_v12 = vpop.permute.xlu1 %84  ;;  %v58_v13 = vpop.permute.xlu0 %57 }
  0x82   :  { %v105_v36 = vmul.f32 %v103_v30, %v85_v12  ;;  %v242_v12 = vld [vmem:[%s2118_s5 + $0x8] sm:$0xff] }
  0x85   :  { %v89_v14 = vpop.permute.xlu1 %88  ;;  %v63_v15 = vpop.permute.xlu0 %62 }
  0x86   :  { %v106_v48 = vmul.f32 %v103_v30, %v89_v14  ;;  %v244_v14 = vld [vmem:[%s2118_s5 + $0x18] sm:$0xff] }
  0x89   :  { %v68_v17 = vpop.permute.xlu0 %67 }
  0x8a   :  { %v119_v16 = vpop.permute.xlu1 %118 }
  0x8e   :  { %v46_v19 = vpop.permute.xlu1 %45  ;;  %v97_v22 = vpop.permute.xlu0 %96 }
  0x8f   :  { %v47_v24 = vmul.f32 %v46_v19, %v1779_v20  ;;  %v108_v50 = vmul.f32 %v103_v30, %v97_v22 }
  0x91   :  { %v78_v28 = vrot.slane %v47_v24, %v1783_v25 }
  0x92   :  { %v73_v23 = vpop.permute.xlu1 %72 }
  0x93   :  { %v115_v26 = vpop.permute.xlu0 %114  ;;  %v79_v35 = vmul.f32 %v78_v28, %v58_v13  ;;  %v81_v37 = vmul.f32 %v78_v28, %v68_v17  ;;  %v80_v44 = vmul.f32 %v78_v28, %v63_v15  ;;  %v82_v52 = vmul.f32 %v78_v28, %v73_v23  ;;  %v243_v13 = vld [vmem:[%s2118_s5 + $0x10] sm:$0xff] }
  0x95   :  { %v109_v42 = vadd.f32 %v105_v36, %v79_v35  ;;  %v110_v55 = vadd.f32 %v106_v48, %v80_v44  ;;  %v112_v60 = vadd.f32 %v108_v50, %v82_v52 }
  0x97   :  { %v93_v27 = vpop.permute.xlu1 %92  ;;  %v127_v34 = vpop.permute.xlu0 %126 }
  0x98   :  { %v107_v32 = vmul.f32 %v103_v30, %v93_v27 }
  0x9a   :  { %v111_v40 = vadd.f32 %v107_v32, %v81_v37 }
  0x9b   :  { %v49_v31 = vpop.permute.xlu1 %48 }
  0x9c   :  { %v50_v33 = vmul.f32 %v49_v31, %v1789_v29  ;;  %v158_v45 = vpop.permute.xlu0 %157 }
  0x9e   :  { %v132_v38 = vrot.slane %v50_v33, %v1783_v25 }
  0x9f   :  { %v123_v39 = vpop.permute.xlu1 %122 }
  0xa0   :  { %v135_v41 = vmul.f32 %v132_v38, %v123_v39  ;;  %v133_v43 = vmul.f32 %v132_v38, %v115_v26  ;;  %v134_v49 = vmul.f32 %v132_v38, %v119_v16  ;;  %v136_v56 = vmul.f32 %v132_v38, %v127_v34 }
  0xa1   :  { %v1820_v16 = vrot.slane %v1779_v20, %v1783_v25  ;;  %v1828_v20 = vrot.slane %v1789_v29, %v1783_v25  ;;  %v226_v25 = vld [vmem:[%s2117_s4 + $0x8] sm:$0xff]  ;;  %v227_v29 = vld [vmem:[%s2117_s4 + $0x10] sm:$0xff] }
  0xa2   :  { %v139_v46 = vadd.f32 %v135_v41, %v111_v40  ;;  %v137_v47 = vadd.f32 %v133_v43, %v109_v42  ;;  %v138_v58 = vadd.f32 %v134_v49, %v110_v55  ;;  %v140_v1 = vadd.f32 %v136_v56, %v112_v60  ;;  %v228_v40 = vld [vmem:[%s2117_s4 + $0x18] sm:$0xff] }
  0xa4   :  { %v148_v51 = vpop.permute.xlu1 %147  ;;  %v167_v53 = vadd.f32 %v158_v45, %v139_v46 }
  0xa5   :  { %v165_v54 = vadd.f32 %v148_v51, %v137_v47 }
  0xa6   :  { %v175_v61 = vmul.f32 0.2, %v167_v53  ;;  %vm171_vm1 = vcmp.gt.f32.partialorder %v167_v53, 0.0 }
  0xa7   :  { %v173_v57 = vmul.f32 0.2, %v165_v54  ;;  %vm169_vm0 = vcmp.gt.f32.partialorder %v165_v54, 0.0 }
  0xa8   :  { %v153_v59 = vpop.permute.xlu1 %152  ;;  %v179_v5 = vsel %vm171_vm1, %v167_v53, %v175_v61 }
  0xa9   :  { %v166_v62 = vadd.f32 %v153_v59, %v138_v58  ;;  %v177_v63 = vsel %vm169_vm0, %v165_v54, %v173_v57 }
  0xaa   :  { %181 = vrot.lane.b32.xlu1 %v177_v63, %s1674_s13 }
  0xab   :  { %v174_v0 = vmul.f32 0.2, %v166_v62  ;;  %vm170_vm2 = vcmp.gt.f32.partialorder %v166_v62, 0.0 }
  0xac   :  { %v163_v2 = vpop.permute.xlu1 %162 }
  0xad   :  { %v168_v3 = vadd.f32 %v163_v2, %v140_v1  ;;  %v178_v4 = vsel %vm170_vm2, %v166_v62, %v174_v0  ;;  %v411_v0 = vld [vmem:[%s2119_s6] sm:$0xff]  ;;  %v430_v2 = vld [vmem:[%s2120_s7 + $0x18] sm:$0xff] }
  0xae   :  { %183 = vrot.lane.b32.xlu0 %v178_v4, %s1674_s13  ;;  %185 = vrot.lane.b32.xlu1 %v179_v5, %s1674_s13  ;;  %v1530_v6 = vpack.c.bf16 %v178_v4, %v177_v63  ;;  %v427_v1 = vld [vmem:[%s2120_s7] sm:$0xff] }
  0xaf   :  { %v176_v7 = vmul.f32 0.2, %v168_v3  ;;  %vm172_vm3 = vcmp.gt.f32.partialorder %v168_v3, 0.0  ;;  %1452 = vmatprep.mubr.msk.f32.mxu1 %vm265_vm4, %v411_v0 }
  0xb1   :  { %v180_v8 = vsel %vm172_vm3, %v168_v3, %v176_v7  ;;  %v429_v3 = vld [vmem:[%s2120_s7 + $0x10] sm:$0xff] }
  0xb2   :  { %187 = vrot.lane.b32.xlu0 %v180_v8, %s1674_s13  ;;  %205 = vrot.lane.b32.xlu1 %v177_v63, %s1675_s0  ;;  %v1534_v9 = vpack.c.bf16 %v180_v8, %v179_v5  ;;  %v428_v63 = vld [vmem:[%s2120_s7 + $0x8] sm:$0xff] }
  0xb6   :  { %207 = vrot.lane.b32.xlu0 %v178_v4, %s1675_s0  ;;  %209 = vrot.lane.b32.xlu1 %v179_v5, %s1675_s0 }
  0xba   :  { %211 = vrot.lane.b32.xlu0 %v180_v8, %s1675_s0  ;;  %247 = vperm.xlu1 %1605, %v241_v10  }
  0xbe   :  { %252 = vperm.xlu0 %1606, %v242_v12   ;;  %257 = vperm.xlu1 %1605, %v243_v13  }
  0xc2   :  { %262 = vperm.xlu0 %1606, %v244_v14  }
 0x11c   :  { %v182_v15 = vpop.permute.xlu1 %181 }
 0x11d   :  { %v193_v19 = vmul.f32 %v1820_v16, %v182_v15 }
 0x120   :  { %v184_v17 = vpop.permute.xlu0 %183  ;;  %v186_v22 = vpop.permute.xlu1 %185 }
 0x121   :  { %v194_v21 = vmul.f32 %v1820_v16, %v184_v17  ;;  %v195_v26 = vmul.f32 %v1820_v16, %v186_v22 }
 0x123   :  { %v1522_v23 = vpack.c.bf16 %v194_v21, %v193_v19 }
 0x124   :  { %v188_v24 = vpop.permute.xlu0 %187  ;;  %v206_v31 = vpop.permute.xlu1 %205 }
 0x125   :  { %v196_v27 = vmul.f32 %v1820_v16, %v188_v24  ;;  %1523 = vmatprep.subr.bf16.mxu0 %v1522_v23  ;;  %v217_v34 = vmul.f32 %v1828_v20, %v206_v31  ;;  %v633_v31 = vld [vmem:[%s2121_s8] sm:$0xff] }
 0x126   :  { %1525 = vmatpush3.bf16.msra.mxu0 %v1522_v23 }
 0x127   :  { %v1526_v28 = vpack.c.bf16 %v196_v27, %v195_v26  ;;  %v412_v27 = vld [vmem:[%s2119_s6 + $0x8] sm:$0xff] }
 0x128   :  { %v208_v30 = vpop.permute.xlu0 %207  ;;  %v210_v35 = vpop.permute.xlu1 %209 }
 0x129   :  { %1527 = vmatprep.subr.bf16.mxu0 %v1526_v28  ;;  %v218_v32 = vmul.f32 %v1828_v20, %v208_v30  ;;  %v219_v38 = vmul.f32 %v1828_v20, %v210_v35  ;;  %v414_v30 = vld [vmem:[%s2119_s6 + $0x18] sm:$0xff] }
 0x12a   :  { %1529 = vmatpush3.bf16.msra.mxu0 %v1526_v28  ;;  %v413_v28 = vld [vmem:[%s2119_s6 + $0x10] sm:$0xff]  ;;  %s1676_s6 = smov 96  }
 0x12b   :  { %1531 = vmatprep.subr.bf16.mxu0 %v1530_v6  ;;  %v1538_v36 = vpack.c.bf16 %v218_v32, %v217_v34  ;;  %v636_v34 = vld [vmem:[%s2121_s8 + $0x18] sm:$0xff] }
 0x12c   :  { %v212_v33 = vpop.permute.xlu0 %211 }
 0x12d   :  { %v220_v37 = vmul.f32 %v1828_v20, %v212_v33  ;;  %v635_v33 = vld [vmem:[%s2121_s8 + $0x10] sm:$0xff] }
 0x12e   :  { %1533 = vmatpush3.bf16.msra.mxu0 %v1530_v6  ;;  %v1574_v35 = vpack.c.bf16 %v636_v34, %v635_v33 }
 0x12f   :  { %1535 = vmatprep.subr.bf16.mxu0 %v1534_v9  ;;  %v1542_v39 = vpack.c.bf16 %v220_v37, %v219_v38 }
 0x132   :  { %1537 = vmatpush3.bf16.msra.mxu0 %v1534_v9 }
 0x133   :  { %1539 = vmatprep.subr.bf16.mxu0 %v1538_v36 }
 0x136   :  { %1541 = vmatpush3.bf16.msra.mxu0 %v1538_v36 }
 0x137   :  { %1543 = vmatprep.subr.bf16.mxu0 %v1542_v39 }
 0x139   :  { %v248_v42 = vpop.permute.xlu1 %247 }
 0x13a   :  { %1545 = vmatpush3.bf16.msra.mxu0 %v1542_v39 }
 0x13d   :  { %1423 = vmatmul.mubr.msk.f32.vlgmr.msra.gmra.mrb[0].mxu0 %vm265_vm4, %v226_v25  ;;  %v253_v41 = vpop.permute.xlu0 %252  ;;  %v258_v51 = vpop.permute.xlu1 %257 }
 0x13e   :  { %1425 = vmatprep.mubr.msk.f32.mxu0 %vm265_vm4, %v227_v29 }
 0x141   :  { %1426 = vmatmul.mubr.msk.f32.gmra.mrb[2].mxu0 %vm265_vm4, %v228_v40  ;;  %v263_v48 = vpop.permute.xlu0 %262 }
 0x210   :  { %v1424_v43 = vpop.f32.mrb[0].mxu0 }
 0x211   :  { %v350_v44 = vadd.f32 %v1424_v43, %v253_v41  ;;  %v344_v45 = vpop.f32.mrb[1].mxu0 }
 0x212   :  { %v345_v46 = vadd.f32 %v344_v45, %v248_v42 }
 0x213   :  { %v368_v47 = vmul.f32 0.2, %v350_v44  ;;  %vm364_vm5 = vcmp.gt.f32.partialorder %v350_v44, 0.0 }
 0x214   :  { %v367_v49 = vmul.f32 0.2, %v345_v46  ;;  %v1427_v50 = vpop.f32.mrb[2].mxu0  ;;  %vm363_vm6 = vcmp.gt.f32.partialorder %v345_v46, 0.0 }
 0x215   :  { %v360_v52 = vadd.f32 %v1427_v50, %v263_v48  ;;  %v354_v53 = vpop.f32.mrb[3].mxu0  ;;  %v372_v54 = vsel %vm364_vm5, %v350_v44, %v368_v47 }
 0x216   :  { %v355_v55 = vadd.f32 %v354_v53, %v258_v51  ;;  %377 = vrot.lane.b32.xlu0 %v372_v54, %s1674_s13  ;;  %v371_v56 = vsel %vm363_vm6, %v345_v46, %v367_v49 }
 0x217   :  { %v370_v57 = vmul.f32 0.2, %v360_v52  ;;  %375 = vrot.lane.b32.xlu1 %v371_v56, %s1674_s13  ;;  %vm366_vm7 = vcmp.gt.f32.partialorder %v360_v52, 0.0  ;;  %v1554_v58 = vpack.c.bf16 %v372_v54, %v371_v56 }
 0x218   :  { %v369_v59 = vmul.f32 0.2, %v355_v55  ;;  %vm365_vm8 = vcmp.gt.f32.partialorder %v355_v55, 0.0 }
 0x219   :  { %v374_v60 = vsel %vm366_vm7, %v360_v52, %v370_v57 }
 0x21a   :  { %381 = vrot.lane.b32.xlu0 %v374_v60, %s1674_s13  ;;  %v373_v61 = vsel %vm365_vm8, %v355_v55, %v369_v59  ;;  %v886_v59 = vld [vmem:[%s2123_s10 + $0x8] sm:$0xff] }
 0x21b   :  { %379 = vrot.lane.b32.xlu1 %v373_v61, %s1674_s13  ;;  %v1558_v62 = vpack.c.bf16 %v374_v60, %v373_v61 }
 0x21e   :  { %397 = vrot.lane.b32.xlu0 %v372_v54, %s1675_s0 }
 0x21f   :  { %395 = vrot.lane.b32.xlu1 %v371_v56, %s1675_s0 }
 0x222   :  { %401 = vrot.lane.b32.xlu0 %v374_v60, %s1675_s0 }
 0x223   :  { %399 = vrot.lane.b32.xlu1 %v373_v61, %s1675_s0  ;;  %v887_v61 = vld [vmem:[%s2123_s10 + $0x10] sm:$0xff] }
 0x226   :  { %438 = vperm.xlu0 %1606, %v428_v63  }
 0x227   :  { %433 = vperm.xlu1 %1605, %v427_v1  }
 0x22a   :  { %448 = vperm.xlu0 %1606, %v430_v2  }
 0x22b   :  { %443 = vperm.xlu1 %1605, %v429_v3  }
 0x288   :  { %v378_v4 = vpop.permute.xlu0 %377 }
 0x289   :  { %v384_v5 = vmul.f32 %v378_v4, %v1820_v16  ;;  %v376_v6 = vpop.permute.xlu1 %375 }
 0x28a   :  { %v383_v7 = vmul.f32 %v376_v6, %v1820_v16 }
 0x28c   :  { %v382_v8 = vpop.permute.xlu0 %381  ;;  %v1546_v9 = vpack.c.bf16 %v384_v5, %v383_v7 }
 0x28d   :  { %v386_v10 = vmul.f32 %v382_v8, %v1820_v16  ;;  %v380_v11 = vpop.permute.xlu1 %379 }
 0x28e   :  { %v385_v12 = vmul.f32 %v380_v11, %v1820_v16  ;;  %1547 = vmatprep.subr.bf16.mxu1 %v1546_v9 }
 0x28f   :  { %1549 = vmatpush3.bf16.msra.mxu1 %v1546_v9 }
 0x290   :  { %v1550_v13 = vpack.c.bf16 %v386_v10, %v385_v12  ;;  %v398_v14 = vpop.permute.xlu0 %397 }
 0x291   :  { %v396_v15 = vpop.permute.xlu1 %395  ;;  %v404_v17 = vmul.f32 %v398_v14, %v1828_v20 }
 0x292   :  { %1551 = vmatprep.subr.bf16.mxu1 %v1550_v13  ;;  %v403_v19 = vmul.f32 %v396_v15, %v1828_v20 }
 0x293   :  { %1553 = vmatpush3.bf16.msra.mxu1 %v1550_v13 }
 0x294   :  { %1555 = vmatprep.subr.bf16.mxu1 %v1554_v58  ;;  %v402_v21 = vpop.permute.xlu0 %401  ;;  %v1562_v23 = vpack.c.bf16 %v404_v17, %v403_v19 }
 0x295   :  { %v400_v22 = vpop.permute.xlu1 %399  ;;  %v406_v24 = vmul.f32 %v402_v21, %v1828_v20 }
 0x296   :  { %v405_v16 = vmul.f32 %v400_v22, %v1828_v20  ;;  %v634_v20 = vld [vmem:[%s2121_s8 + $0x8] sm:$0xff]  ;;  %s1677_s8 = smov 64  }
 0x297   :  { %1557 = vmatpush3.bf16.msra.mxu1 %v1554_v58  ;;  %v1570_v32 = vpack.c.bf16 %v634_v20, %v633_v31  ;;  %v885_v58 = vld [vmem:[%s2123_s10] sm:$0xff] }
 0x298   :  { %1559 = vmatprep.subr.bf16.mxu1 %v1558_v62  ;;  %v1566_v26 = vpack.c.bf16 %v406_v24, %v405_v16  ;;  %v1578_v60 = vpack.c.bf16 %v886_v59, %v885_v58 }
 0x299   :  { %1571 = vmatprep.subr.bf16.mxu0 %v1570_v32 }
 0x29a   :  { %1573 = vmatpush3.bf16.msra.mxu0 %v1570_v32 }
 0x29b   :  { %1561 = vmatpush3.bf16.msra.mxu1 %v1558_v62  ;;  %1575 = vmatprep.subr.bf16.mxu0 %v1574_v35  ;;  %v888_v62 = vld [vmem:[%s2123_s10 + $0x18] sm:$0xff] }
 0x29c   :  { %1563 = vmatprep.subr.bf16.mxu1 %v1562_v23  ;;  %v1582_v63 = vpack.c.bf16 %v888_v62, %v887_v61 }
 0x29e   :  { %1577 = vmatpush3.bf16.msra.mxu0 %v1574_v35 }
 0x29f   :  { %1565 = vmatpush3.bf16.msra.mxu1 %v1562_v23 }
 0x2a0   :  { %1567 = vmatprep.subr.bf16.mxu1 %v1566_v26 }
 0x2a3   :  { %1569 = vmatpush3.bf16.msra.mxu1 %v1566_v26 }
 0x2a4   :  { %1579 = vmatprep.subr.bf16.mxu1 %v1578_v60 }
 0x2a5   :  { %v439_v36 = vpop.permute.xlu0 %438 }
 0x2a6   :  { %1453 = vmatmul.mubr.msk.f32.vlgmr.msra.gmra.mrb[0].mxu1 %vm265_vm4, %v412_v27  ;;  %v434_v37 = vpop.permute.xlu1 %433  ;;  %v1949_v27 = vld [vmem:[%s2122_s9] ss:$0 sm:$0xff] }
 0x2a7   :  { %1455 = vmatprep.mubr.msk.f32.mxu1 %vm265_vm4, %v413_v28  ;;  %1581 = vmatpush3.bf16.msra.mxu1 %v1578_v60 }
 0x2a8   :  { %1583 = vmatprep.subr.bf16.mxu1 %v1582_v63 }
 0x2a9   :  { %v449_v41 = vpop.permute.xlu0 %448 }
 0x2aa   :  { %1456 = vmatmul.mubr.msk.f32.gmra.mrb[2].mxu1 %vm265_vm4, %v414_v30  ;;  %v444_v44 = vpop.permute.xlu1 %443 }
 0x2ab   :  { %1585 = vmatpush3.bf16.msra.mxu1 %v1582_v63 }
 0x379   :  { %v1454_v38 = vpop.f32.mrb[0].mxu1 }
 0x37a   :  { %v535_v39 = vadd.f32 %v1454_v38, %v439_v36  ;;  %v529_v25 = vpop.f32.mrb[1].mxu1 }
 0x37b   :  { %v530_v29 = vadd.f32 %v529_v25, %v434_v37 }
 0x37c   :  { %vm549_vm9 = vcmp.gt.f32.partialorder %v535_v39, 0.0  ;;  %v553_v40 = vmul.f32 0.2, %v535_v39 }
 0x37d   :  { %vm548_vm11 = vcmp.gt.f32.partialorder %v530_v29, 0.0  ;;  %v552_v42 = vmul.f32 0.2, %v530_v29  ;;  %v1457_v43 = vpop.f32.mrb[2].mxu1 }
 0x37e   :  { %v545_v45 = vadd.f32 %v1457_v43, %v449_v41  ;;  %v539_v46 = vpop.f32.mrb[3].mxu1  ;;  %v557_v47 = vsel %vm549_vm9, %v535_v39, %v553_v40 }
 0x37f   :  { %v540_v48 = vadd.f32 %v539_v46, %v444_v44  ;;  %571 = vrot.lane.b32.xlu0 %v557_v47, %s1676_s6  ;;  %562 = vst.msk [vmem:[#allocation3 + $0x8] sm:$0xff] %vm560_vm10, %v557_v47  ;;  %v556_v49 = vsel %vm548_vm11, %v530_v29, %v552_v42 }
 0x380   :  { %vm551_vm12 = vcmp.gt.f32.partialorder %v545_v45, 0.0  ;;  %v555_v50 = vmul.f32 0.2, %v545_v45  ;;  %569 = vrot.lane.b32.xlu1 %v556_v49, %s1676_s6  ;;  %561 = vst.msk [vmem:[#allocation3] sm:$0xff] %vm560_vm10, %v556_v49 }
 0x381   :  { %vm550_vm13 = vcmp.gt.f32.partialorder %v540_v48, 0.0  ;;  %v554_v51 = vmul.f32 0.2, %v540_v48 }
 0x382   :  { %v559_v52 = vsel %vm551_vm12, %v545_v45, %v555_v50 }
 0x383   :  { %575 = vrot.lane.b32.xlu0 %v559_v52, %s1676_s6  ;;  %564 = vst.msk [vmem:[#allocation3 + $0x18] sm:$0xff] %vm560_vm10, %v559_v52  ;;  %v558_v53 = vsel %vm550_vm13, %v540_v48, %v554_v51 }
 0x384   :  { %563 = vst.msk [vmem:[#allocation3 + $0x10] sm:$0xff] %vm560_vm10, %v558_v53  ;;  %573 = vrot.lane.b32.xlu1 %v558_v53, %s1676_s6 }
 0x386   :  { %v618_v55 = vld [vmem:[#allocation3 + $0x8] sm:$0xff] }
 0x387   :  { %587 = vrot.lane.b32.xlu0 %v557_v47, %s1677_s8  ;;  %v617_v54 = vld [vmem:[#allocation3] sm:$0xff] }
 0x388   :  { %585 = vrot.lane.b32.xlu1 %v556_v49, %s1677_s8  ;;  %1466 = vmatprep.mubr.msk.f32.mxu0 %vm560_vm10, %v617_v54 }
 0x389   :  { %1467 = vmatmul.mubr.msk.f32.vlgmr.msra.gmra.mrb[4].mxu0 %vm560_vm10, %v618_v55 }
 0x38a   :  { %v620_v57 = vld [vmem:[#allocation3 + $0x18] sm:$0xff] }
 0x38b   :  { %591 = vrot.lane.b32.xlu0 %v559_v52, %s1677_s8  ;;  %v619_v56 = vld [vmem:[#allocation3 + $0x10] sm:$0xff] }
 0x38c   :  { %589 = vrot.lane.b32.xlu1 %v558_v53, %s1677_s8  ;;  %1469 = vmatprep.mubr.msk.f32.mxu0 %vm560_vm10, %v619_v56 }
 0x38d   :  { %1470 = vmatmul.mubr.msk.f32.gmra.mrb[6].mxu0 %vm560_vm10, %v620_v57 }
 0x38f   :  { %603 = vrot.lane.b32.xlu0 %v557_v47, %s1678_s19 }
 0x390   :  { %601 = vrot.lane.b32.xlu1 %v556_v49, %s1678_s19 }
 0x393   :  { %607 = vrot.lane.b32.xlu0 %v559_v52, %s1678_s19 }
 0x394   :  { %605 = vrot.lane.b32.xlu1 %v558_v53, %s1678_s19 }
 0x3f1   :  { %v572_v0 = vpop.permute.xlu0 %571 }
 0x3f2   :  { %582 = vst.msk [vmem:[#allocation3 + $0x28] sm:$0xff] %vm560_vm10, %v572_v0  ;;  %v570_v1 = vpop.permute.xlu1 %569 }
 0x3f3   :  { %581 = vst.msk [vmem:[#allocation3 + $0x20] sm:$0xff] %vm560_vm10, %v570_v1 }
 0x3f5   :  { %v576_v2 = vpop.permute.xlu0 %575 }
 0x3f6   :  { %584 = vst.msk [vmem:[#allocation3 + $0x38] sm:$0xff] %vm560_vm10, %v576_v2  ;;  %v574_v3 = vpop.permute.xlu1 %573 }
 0x3f7   :  { %583 = vst.msk [vmem:[#allocation3 + $0x30] sm:$0xff] %vm560_vm10, %v574_v3 }
 0x3f9   :  { %v588_v4 = vpop.permute.xlu0 %587  ;;  %v622_v7 = vld [vmem:[#allocation3 + $0x28] sm:$0xff] }
 0x3fa   :  { %598 = vst.msk [vmem:[#allocation3 + $0x48] sm:$0xff] %vm560_vm10, %v588_v4  ;;  %v586_v5 = vpop.permute.xlu1 %585  ;;  %v621_v6 = vld [vmem:[#allocation3 + $0x20] sm:$0xff] }
 0x3fb   :  { %597 = vst.msk [vmem:[#allocation3 + $0x40] sm:$0xff] %vm560_vm10, %v586_v5  ;;  %1472 = vmatprep.mubr.msk.f32.mxu0 %vm560_vm10, %v621_v6 }
 0x3fc   :  { %1473 = vmatmul.mubr.msk.f32.gmra.mrb[8].mxu0 %vm560_vm10, %v622_v7 }
 0x3fd   :  { %v592_v8 = vpop.permute.xlu0 %591  ;;  %v624_v11 = vld [vmem:[#allocation3 + $0x38] sm:$0xff] }
 0x3fe   :  { %600 = vst.msk [vmem:[#allocation3 + $0x58] sm:$0xff] %vm560_vm10, %v592_v8  ;;  %v590_v9 = vpop.permute.xlu1 %589  ;;  %v623_v10 = vld [vmem:[#allocation3 + $0x30] sm:$0xff] }
 0x3ff   :  { %599 = vst.msk [vmem:[#allocation3 + $0x50] sm:$0xff] %vm560_vm10, %v590_v9  ;;  %1475 = vmatprep.mubr.msk.f32.mxu0 %vm560_vm10, %v623_v10 }
 0x400   :  { %1476 = vmatmul.mubr.msk.f32.gmra.mrb[10].mxu0 %vm560_vm10, %v624_v11 }
 0x401   :  { %v604_v12 = vpop.permute.xlu0 %603  ;;  %v626_v15 = vld [vmem:[#allocation3 + $0x48] sm:$0xff] }
 0x402   :  { %614 = vst.msk [vmem:[#allocation3 + $0x68] sm:$0xff] %vm560_vm10, %v604_v12  ;;  %v602_v13 = vpop.permute.xlu1 %601  ;;  %v625_v14 = vld [vmem:[#allocation3 + $0x40] sm:$0xff] }
 0x403   :  { %613 = vst.msk [vmem:[#allocation3 + $0x60] sm:$0xff] %vm560_vm10, %v602_v13  ;;  %1478 = vmatprep.mubr.msk.f32.mxu0 %vm560_vm10, %v625_v14 }
 0x404   :  { %1479 = vmatmul.mubr.msk.f32.gmra.mrb[12].mxu0 %vm560_vm10, %v626_v15 }
 0x405   :  { %v608_v17 = vpop.permute.xlu0 %607  ;;  %v628_v22 = vld [vmem:[#allocation3 + $0x58] sm:$0xff] }
 0x406   :  { %616 = vst.msk [vmem:[#allocation3 + $0x78] sm:$0xff] %vm560_vm10, %v608_v17  ;;  %v606_v19 = vpop.permute.xlu1 %605  ;;  %v627_v21 = vld [vmem:[#allocation3 + $0x50] sm:$0xff] }
 0x407   :  { %615 = vst.msk [vmem:[#allocation3 + $0x70] sm:$0xff] %vm560_vm10, %v606_v19  ;;  %1481 = vmatprep.mubr.msk.f32.mxu0 %vm560_vm10, %v627_v21 }
 0x408   :  { %1482 = vmatmul.mubr.msk.f32.gmra.mrb[14].mxu0 %vm560_vm10, %v628_v22 }
 0x409   :  { %v630_v24 = vld [vmem:[#allocation3 + $0x68] sm:$0xff] }
 0x40a   :  { %v629_v23 = vld [vmem:[#allocation3 + $0x60] sm:$0xff] }
 0x40b   :  { %1484 = vmatprep.mubr.msk.f32.mxu0 %vm560_vm10, %v629_v23 }
 0x40c   :  { %1485 = vmatmul.mubr.msk.f32.gmra.mrb[16].mxu0 %vm560_vm10, %v630_v24 }
 0x40d   :  { %v632_v26 = vld [vmem:[#allocation3 + $0x78] sm:$0xff] }
 0x40e   :  { %v631_v16 = vld [vmem:[#allocation3 + $0x70] sm:$0xff] }
 0x40f   :  { %1487 = vmatprep.mubr.msk.f32.mxu0 %vm560_vm10, %v631_v16 }
 0x410   :  { %1488 = vmatmul.mubr.msk.f32.gmra.mrb[18].mxu0 %vm560_vm10, %v632_v26 }
 0x45c   :  { %v1468_v28 = vpop.f32.mrb[4].mxu0 }
 0x45d   :  { %v764_v30 = vadd.f32 %v1468_v28, %v1949_v27  ;;  %v758_v31 = vpop.f32.mrb[5].mxu0 }
 0x45e   :  { %v759_v20 = vadd.f32 %v1949_v27, %v758_v31 }
 0x45f   :  { %v854_v32 = vmul.f32 0.2, %v764_v30  ;;  %vm838_vm14 = vcmp.gt.f32.partialorder %v764_v30, 0.0 }
 0x460   :  { %vm837_vm15 = vcmp.gt.f32.partialorder %v759_v20, 0.0  ;;  %v853_v33 = vmul.f32 0.2, %v759_v20  ;;  %v1471_v34 = vpop.f32.mrb[6].mxu0 }
 0x461   :  { %v774_v35 = vadd.f32 %v1471_v34, %v1949_v27  ;;  %v768_v36 = vpop.f32.mrb[7].mxu0  ;;  %v870_v39 = vsel %vm838_vm14, %v764_v30, %v854_v32 }
 0x462   :  { %v769_v37 = vadd.f32 %v1949_v27, %v768_v36  ;;  %v869_v38 = vsel %vm837_vm15, %v759_v20, %v853_v33 }
 0x463   :  { %v856_v25 = vmul.f32 0.2, %v774_v35  ;;  %1498 = vmatprep.mubr.msk.f32.mxu1 %vm560_vm10, %v869_v38  ;;  %vm840_vm0 = vcmp.gt.f32.partialorder %v774_v35, 0.0 }
 0x464   :  { %vm839_vm1 = vcmp.gt.f32.partialorder %v769_v37, 0.0  ;;  %v855_v29 = vmul.f32 0.2, %v769_v37  ;;  %1499 = vmatmul.mubr.msk.f32.vlgmr.msra.gmra.mrb[4].mxu1 %vm560_vm10, %v870_v39 }
 0x465   :  { %v872_v41 = vsel %vm840_vm0, %v774_v35, %v856_v25 }
 0x466   :  { %v871_v40 = vsel %vm839_vm1, %v769_v37, %v855_v29 }
 0x467   :  { %1501 = vmatprep.mubr.msk.f32.mxu1 %vm560_vm10, %v871_v40 }
 0x468   :  { %1502 = vmatmul.mubr.msk.f32.gmra.mrb[6].mxu1 %vm560_vm10, %v872_v41 }
 0x4cf   :  { %v1474_v42 = vpop.f32.mrb[8].mxu0 }
 0x4d0   :  { %v784_v43 = vadd.f32 %v1474_v42, %v1949_v27  ;;  %v778_v44 = vpop.f32.mrb[9].mxu0 }
 0x4d1   :  { %v779_v45 = vadd.f32 %v1949_v27, %v778_v44 }
 0x4d2   :  { %v858_v46 = vmul.f32 0.2, %v784_v43  ;;  %vm842_vm2 = vcmp.gt.f32.partialorder %v784_v43, 0.0 }
 0x4d3   :  { %vm841_vm3 = vcmp.gt.f32.partialorder %v779_v45, 0.0  ;;  %v857_v47 = vmul.f32 0.2, %v779_v45  ;;  %v1477_v48 = vpop.f32.mrb[10].mxu0 }
 0x4d4   :  { %v794_v49 = vadd.f32 %v1477_v48, %v1949_v27  ;;  %v788_v50 = vpop.f32.mrb[11].mxu0  ;;  %v874_v54 = vsel %vm842_vm2, %v784_v43, %v858_v46 }
 0x4d5   :  { %v789_v51 = vadd.f32 %v1949_v27, %v788_v50  ;;  %v873_v52 = vsel %vm841_vm3, %v779_v45, %v857_v47 }
 0x4d6   :  { %v860_v53 = vmul.f32 0.2, %v794_v49  ;;  %1504 = vmatprep.mubr.msk.f32.mxu1 %vm560_vm10, %v873_v52  ;;  %vm844_vm4 = vcmp.gt.f32.partialorder %v794_v49, 0.0 }
 0x4d7   :  { %vm843_vm5 = vcmp.gt.f32.partialorder %v789_v51, 0.0  ;;  %v859_v55 = vmul.f32 0.2, %v789_v51  ;;  %v1480_v56 = vpop.f32.mrb[12].mxu0  ;;  %1505 = vmatmul.mubr.msk.f32.gmra.mrb[8].mxu1 %vm560_vm10, %v874_v54 }
 0x4d8   :  { %v804_v57 = vadd.f32 %v1480_v56, %v1949_v27  ;;  %v798_v58 = vpop.f32.mrb[13].mxu0  ;;  %v876_v62 = vsel %vm844_vm4, %v794_v49, %v860_v53 }
 0x4d9   :  { %v799_v59 = vadd.f32 %v1949_v27, %v798_v58  ;;  %v875_v60 = vsel %vm843_vm5, %v789_v51, %v859_v55 }
 0x4da   :  { %v862_v61 = vmul.f32 0.2, %v804_v57  ;;  %1507 = vmatprep.mubr.msk.f32.mxu1 %vm560_vm10, %v875_v60  ;;  %vm846_vm6 = vcmp.gt.f32.partialorder %v804_v57, 0.0 }
 0x4db   :  { %vm845_vm7 = vcmp.gt.f32.partialorder %v799_v59, 0.0  ;;  %v861_v63 = vmul.f32 0.2, %v799_v59  ;;  %v1483_v0 = vpop.f32.mrb[14].mxu0  ;;  %1508 = vmatmul.mubr.msk.f32.gmra.mrb[10].mxu1 %vm560_vm10, %v876_v62 }
 0x4dc   :  { %v814_v1 = vadd.f32 %v1483_v0, %v1949_v27  ;;  %v808_v2 = vpop.f32.mrb[15].mxu0  ;;  %v878_v6 = vsel %vm846_vm6, %v804_v57, %v862_v61 }
 0x4dd   :  { %v809_v3 = vadd.f32 %v1949_v27, %v808_v2  ;;  %v877_v4 = vsel %vm845_vm7, %v799_v59, %v861_v63  ;;  %v1230_v2 = vand.u32 127, %v75_v18 }
 0x4de   :  { %v864_v5 = vmul.f32 0.2, %v814_v1  ;;  %1510 = vmatprep.mubr.msk.f32.mxu1 %vm560_vm10, %v877_v4  ;;  %vm848_vm8 = vcmp.gt.f32.partialorder %v814_v1, 0.0 }
 0x4df   :  { %vm847_vm9 = vcmp.gt.f32.partialorder %v809_v3, 0.0  ;;  %v863_v7 = vmul.f32 0.2, %v809_v3  ;;  %v1486_v8 = vpop.f32.mrb[16].mxu0  ;;  %1511 = vmatmul.mubr.msk.f32.gmra.mrb[12].mxu1 %vm560_vm10, %v878_v6  ;;  %vm1232_vm15 = vcmp.lt.s32.totalorder %v1230_v2, 68 }
 0x4e0   :  { %v824_v9 = vadd.f32 %v1486_v8, %v1949_v27  ;;  %v818_v10 = vpop.f32.mrb[17].mxu0  ;;  %v880_v14 = vsel %vm848_vm8, %v814_v1, %v864_v5 }
 0x4e1   :  { %v819_v11 = vadd.f32 %v1949_v27, %v818_v10  ;;  %v879_v12 = vsel %vm847_vm9, %v809_v3, %v863_v7 }
 0x4e2   :  { %v866_v13 = vmul.f32 0.2, %v824_v9  ;;  %1513 = vmatprep.mubr.msk.f32.mxu1 %vm560_vm10, %v879_v12  ;;  %vm850_vm11 = vcmp.gt.f32.partialorder %v824_v9, 0.0 }
 0x4e3   :  { %vm849_vm12 = vcmp.gt.f32.partialorder %v819_v11, 0.0  ;;  %v865_v15 = vmul.f32 0.2, %v819_v11  ;;  %v1489_v17 = vpop.f32.mrb[18].mxu0  ;;  %1514 = vmatmul.mubr.msk.f32.gmra.mrb[14].mxu1 %vm560_vm10, %v880_v14 }
 0x4e4   :  { %v834_v19 = vadd.f32 %v1489_v17, %v1949_v27  ;;  %v828_v21 = vpop.f32.mrb[19].mxu0  ;;  %v882_v16 = vsel %vm850_vm11, %v824_v9, %v866_v13 }
 0x4e5   :  { %v829_v22 = vadd.f32 %v1949_v27, %v828_v21  ;;  %v881_v23 = vsel %vm849_vm12, %v819_v11, %v865_v15  ;;  %v1986_v27 = vld [vmem:[%s2124_s11] ss:$0 sm:$0xff]  ;;  %s1679_s11 = smov [#allocation4]  }
 0x4e6   :  { %v868_v24 = vmul.f32 0.2, %v834_v19  ;;  %1516 = vmatprep.mubr.msk.f32.mxu1 %vm560_vm10, %v881_v23  ;;  %vm852_vm13 = vcmp.gt.f32.partialorder %v834_v19, 0.0  ;;  %s1273_s7 = sshll.u32 %s1679_s11, 4  ;;  %s1274_s7 = int_to_ptr.vmem [resolvable:$true] %s1273_s7 }
 0x4e7   :  { %vm851_vm14 = vcmp.gt.f32.partialorder %v829_v22, 0.0  ;;  %v867_v26 = vmul.f32 0.2, %v829_v22  ;;  %1517 = vmatmul.mubr.msk.f32.gmra.mrb[16].mxu1 %vm560_vm10, %v882_v16  ;;  %s1647_s25 = scalar_lea.vmem %s1274_s7, 2048  ;;  %p1652_p1 = scmp.lt.s32.totalorder %s1274_s7, %s1274_s7 }
 0x4e8   :  { %v884_v30 = vsel %vm852_vm13, %v834_v19, %v868_v24  ;;  %p1648_p0 = scmp.ne.s32.totalorder %s1274_s7, %s1647_s25  ;;  %p1653_p2 = scmp.lt.s32.totalorder %s1647_s25, %s1647_s25 }
 0x4e9   :  { %v883_v28 = vsel %vm851_vm14, %v829_v22, %v867_v26 }
 0x4ea   :  { %1519 = vmatprep.mubr.msk.f32.mxu1 %vm560_vm10, %v883_v28  ;;  %p1654_p3 = por %p1653_p2, %p1652_p1 }
 0x4eb   :  { %1520 = vmatmul.mubr.msk.f32.gmra.mrb[18].mxu1 %vm560_vm10, %v884_v30  ;;  %vm1231_vm10 = vcmp.ge.s32.totalorder %v1230_v2, 64 }
 0x4ec   :  { %vm1993_vm0 = vmand %vm1231_vm10, %vm1232_vm15  ;;  %p1655_p4 = pnand %p1654_p3, %p1648_p0 }
 0x537   :  { %v1500_v31 = vpop.f32.mrb[4].mxu1 }
 0x538   :  { %v1016_v20 = vadd.f32 %v1500_v31, %v1986_v27  ;;  %v1010_v32 = vpop.f32.mrb[5].mxu1 }
 0x539   :  { %v1011_v33 = vadd.f32 %v1986_v27, %v1010_v32 }
 0x53b   :  { %v1089_v34 = vmax.f32 %v1011_v33, %v1016_v20  ;;  %v1503_v35 = vpop.f32.mrb[6].mxu1 }
 0x53c   :  { %v1020_v36 = vpop.f32.mrb[7].mxu1  ;;  %v1026_v38 = vadd.f32 %v1503_v35, %v1986_v27 }
 0x53d   :  { %v1021_v37 = vadd.f32 %v1986_v27, %v1020_v36 }
 0x53f   :  { %v1090_v39 = vmax.f32 %v1089_v34, %v1021_v37 }
 0x541   :  { %v1091_v25 = vmax.f32 %v1090_v39, %v1026_v38 }
 0x543   :  { %v1092_v29 = vrot.slane %v1091_v25, 4 }
 0x545   :  { %v1093_v40 = vmax.f32 %v1091_v25, %v1092_v29 }
 0x547   :  { %v1094_v41 = vrot.slane %v1093_v40, 2 }
 0x549   :  { %v1095_v42 = vmax.f32 %v1093_v40, %v1094_v41 }
 0x54b   :  { %v1096_v43 = vrot.slane %v1095_v42, 1 }
 0x54d   :  { %v1097_v44 = vmax.f32 %v1095_v42, %v1096_v43 }
 0x54f   :  { %v1125_v45 = vsub.f32 %v1011_v33, %v1097_v44  ;;  %v1126_v46 = vsub.f32 %v1016_v20, %v1097_v44  ;;  %v1127_v47 = vsub.f32 %v1021_v37, %v1097_v44  ;;  %v1128_v48 = vsub.f32 %v1026_v38, %v1097_v44 }
 0x551   :  { %v1141_v49 = vmul.f32 1.442695, %v1125_v45  ;;  %v1143_v50 = vmul.f32 1.442695, %v1126_v46  ;;  %v1145_v51 = vmul.f32 1.442695, %v1127_v47 }
 0x552   :  { %v1147_v52 = vmul.f32 1.442695, %v1128_v48 }
 0x553   :  { %1607 = vpow2.f32 %v1141_v49 }
 0x554   :  { %1609 = vpow2.f32 %v1143_v50 }
 0x555   :  { %1611 = vpow2.f32 %v1145_v51 }
 0x556   :  { %1613 = vpow2.f32 %v1147_v52 }
 0x55d   :  { %v1608_v53 = vpop.eup %1607 }
 0x55e   :  { %v1610_v54 = vpop.eup %1609 }
 0x55f   :  { %v1173_v55 = vadd.f32 %v1610_v54, %v1608_v53  ;;  %v1612_v56 = vpop.eup %1611 }
 0x560   :  { %v1614_v58 = vpop.eup %1613 }
 0x561   :  { %v1174_v57 = vadd.f32 %v1612_v56, %v1173_v55 }
 0x563   :  { %v1175_v59 = vadd.f32 %v1614_v58, %v1174_v57 }
 0x565   :  { %v1176_v60 = vrot.slane %v1175_v59, 4 }
 0x567   :  { %v1177_v61 = vadd.f32 %v1176_v60, %v1175_v59 }
 0x569   :  { %v1178_v62 = vrot.slane %v1177_v61, 2 }
 0x56b   :  { %v1179_v63 = vadd.f32 %v1178_v62, %v1177_v61 }
 0x56d   :  { %v1180_v0 = vrot.slane %v1179_v63, 1 }
 0x56f   :  { %v1181_v1 = vadd.f32 %v1180_v0, %v1179_v63 }
 0x571   :  { %1615 = vrcp.f32 %v1181_v1 }
 0x57b   :  { %v1616_v3 = vpop.eup %1615 }
 0x57c   :  { %v1210_v5 = vmul.f32 %v1616_v3, %v1608_v53  ;;  %v1211_v6 = vmul.f32 %v1616_v3, %v1610_v54  ;;  %v1212_v7 = vmul.f32 %v1616_v3, %v1612_v56  ;;  %v1213_v8 = vmul.f32 %v1616_v3, %v1614_v58 }
 0x57e   :  { %v1236_v9 = vsel %vm1993_vm0, %v1210_v5, %v1011_v33  ;;  %v1237_v10 = vsel %vm1993_vm0, %v1211_v6, %v1016_v20  ;;  %v1238_v18 = vsel %vm1993_vm0, %v1212_v7, %v1021_v37  ;;  %v1239_v11 = vsel %vm1993_vm0, %v1213_v8, %v1026_v38 }
 0x57f   :  { %1252 = vst [vmem:[#allocation4] sm:$0xff] %v1236_v9  ;;  %1253 = vst [vmem:[#allocation4 + $0x8] sm:$0xff] %v1237_v10 }
 0x580   :  { %1254 = vst [vmem:[#allocation4 + $0x10] sm:$0xff] %v1238_v18  ;;  %1255 = vst [vmem:[#allocation4 + $0x18] sm:$0xff] %v1239_v11 }
 0x5aa   :  { %v1506_v12 = vpop.f32.mrb[8].mxu1 }
 0x5ab   :  { %v2006_v13 = vadd.f32 %v1506_v12, %v1986_v27  ;;  %v1030_v14 = vpop.f32.mrb[9].mxu1 }
 0x5ac   :  { %v2009_v15 = vadd.f32 %v1986_v27, %v1030_v14 }
 0x5ae   :  { %v1098_v17 = vmax.f32 %v2009_v15, %v2006_v13  ;;  %v1509_v19 = vpop.f32.mrb[10].mxu1 }
 0x5af   :  { %v1040_v21 = vpop.f32.mrb[11].mxu1  ;;  %v2017_v23 = vadd.f32 %v1509_v19, %v1986_v27 }
 0x5b0   :  { %v2014_v22 = vadd.f32 %v1986_v27, %v1040_v21 }
 0x5b2   :  { %v1099_v24 = vmax.f32 %v1098_v17, %v2014_v22  ;;  %v1512_v16 = vpop.f32.mrb[12].mxu1 }
 0x5b3   :  { %v2021_v26 = vadd.f32 %v1512_v16, %v1986_v27  ;;  %v1050_v28 = vpop.f32.mrb[13].mxu1 }
 0x5b4   :  { %v1100_v30 = vmax.f32 %v1099_v24, %v2017_v23  ;;  %v2025_v31 = vadd.f32 %v1986_v27, %v1050_v28 }
 0x5b6   :  { %v1101_v20 = vrot.slane %v1100_v30, 4  ;;  %v1107_v32 = vmax.f32 %v2025_v31, %v2021_v26  ;;  %v1515_v33 = vpop.f32.mrb[14].mxu1 }
 0x5b7   :  { %v1060_v34 = vpop.f32.mrb[15].mxu1  ;;  %v2033_v38 = vadd.f32 %v1515_v33, %v1986_v27 }
 0x5b8   :  { %v1102_v35 = vmax.f32 %v1100_v30, %v1101_v20  ;;  %v2030_v36 = vadd.f32 %v1986_v27, %v1060_v34 }
 0x5ba   :  { %v1103_v37 = vrot.slane %v1102_v35, 2  ;;  %v1108_v39 = vmax.f32 %v1107_v32, %v2030_v36  ;;  %v1518_v25 = vpop.f32.mrb[16].mxu1 }
 0x5bb   :  { %v2037_v29 = vadd.f32 %v1518_v25, %v1986_v27  ;;  %v1070_v40 = vpop.f32.mrb[17].mxu1 }
 0x5bc   :  { %v1104_v41 = vmax.f32 %v1102_v35, %v1103_v37  ;;  %v1109_v42 = vmax.f32 %v1108_v39, %v2033_v38  ;;  %v2041_v43 = vadd.f32 %v1986_v27, %v1070_v40 }
 0x5be   :  { %v1105_v44 = vrot.slane %v1104_v41, 1  ;;  %v1110_v45 = vrot.slane %v1109_v42, 4  ;;  %v1116_v46 = vmax.f32 %v2041_v43, %v2037_v29  ;;  %v1521_v47 = vpop.f32.mrb[18].mxu1 }
 0x5bf   :  { %v1080_v48 = vpop.f32.mrb[19].mxu1  ;;  %v2053_v57 = vadd.f32 %v1521_v47, %v1986_v27 }
 0x5c0   :  { %v1106_v49 = vmax.f32 %v1104_v41, %v1105_v44  ;;  %v1111_v50 = vmax.f32 %v1109_v42, %v1110_v45  ;;  %v2046_v51 = vadd.f32 %v1986_v27, %v1080_v48 }
 0x5c2   :  { %v1129_v52 = vsub.f32 %v2009_v15, %v1106_v49  ;;  %v1130_v53 = vsub.f32 %v2006_v13, %v1106_v49  ;;  %v1131_v54 = vsub.f32 %v2014_v22, %v1106_v49  ;;  %v1132_v55 = vsub.f32 %v2017_v23, %v1106_v49 }
 0x5c3   :  { %v1112_v56 = vrot.slane %v1111_v50, 2  ;;  %v1117_v58 = vmax.f32 %v1116_v46, %v2046_v51 }
 0x5c4   :  { %v1149_v59 = vmul.f32 1.442695, %v1129_v52  ;;  %v1151_v60 = vmul.f32 1.442695, %v1130_v53  ;;  %v1153_v61 = vmul.f32 1.442695, %v1131_v54 }
 0x5c5   :  { %v1113_v62 = vmax.f32 %v1111_v50, %v1112_v56  ;;  %v1118_v63 = vmax.f32 %v1117_v58, %v2053_v57  ;;  %v1155_v0 = vmul.f32 1.442695, %v1132_v55 }
 0x5c6   :  { %1617 = vpow2.f32 %v1149_v59 }
 0x5c7   :  { %1619 = vpow2.f32 %v1151_v60  ;;  %v1114_v1 = vrot.slane %v1113_v62, 1  ;;  %v1119_v2 = vrot.slane %v1118_v63, 4 }
 0x5c8   :  { %1621 = vpow2.f32 %v1153_v61 }
 0x5c9   :  { %v1115_v3 = vmax.f32 %v1113_v62, %v1114_v1  ;;  %v1120_v5 = vmax.f32 %v1118_v63, %v1119_v2  ;;  %1623 = vpow2.f32 %v1155_v0 }
 0x5cb   :  { %v1133_v27 = vsub.f32 %v2025_v31, %v1115_v3  ;;  %v1134_v6 = vsub.f32 %v2021_v26, %v1115_v3  ;;  %v1135_v7 = vsub.f32 %v2030_v36, %v1115_v3  ;;  %v1136_v8 = vsub.f32 %v2033_v38, %v1115_v3 }
 0x5cc   :  { %v1121_v9 = vrot.slane %v1120_v5, 2 }
 0x5cd   :  { %v1157_v10 = vmul.f32 1.442695, %v1133_v27  ;;  %v1159_v18 = vmul.f32 1.442695, %v1134_v6  ;;  %v1161_v11 = vmul.f32 1.442695, %v1135_v7 }
 0x5ce   :  { %v1122_v12 = vmax.f32 %v1120_v5, %v1121_v9  ;;  %v1163_v14 = vmul.f32 1.442695, %v1136_v8 }
 0x5cf   :  { %1625 = vpow2.f32 %v1157_v10 }
 0x5d0   :  { %v1618_v17 = vpop.eup %1617  ;;  %1627 = vpow2.f32 %v1159_v18  ;;  %v1123_v19 = vrot.slane %v1122_v12, 1 }
 0x5d1   :  { %v1620_v21 = vpop.eup %1619  ;;  %1629 = vpow2.f32 %v1161_v11 }
 0x5d2   :  { %v1182_v24 = vadd.f32 %v1620_v21, %v1618_v17  ;;  %v1124_v16 = vmax.f32 %v1122_v12, %v1123_v19  ;;  %v1622_v28 = vpop.eup %1621  ;;  %1631 = vpow2.f32 %v1163_v14 }
 0x5d3   :  { %v1624_v30 = vpop.eup %1623 }
 0x5d4   :  { %v1183_v20 = vadd.f32 %v1622_v28, %v1182_v24  ;;  %v1137_v32 = vsub.f32 %v2041_v43, %v1124_v16  ;;  %v1138_v33 = vsub.f32 %v2037_v29, %v1124_v16  ;;  %v1139_v34 = vsub.f32 %v2046_v51, %v1124_v16 }
 0x5d5   :  { %v1140_v35 = vsub.f32 %v2053_v57, %v1124_v16 }
 0x5d6   :  { %v1184_v37 = vadd.f32 %v1624_v30, %v1183_v20  ;;  %v1165_v39 = vmul.f32 1.442695, %v1137_v32  ;;  %v1167_v25 = vmul.f32 1.442695, %v1138_v33  ;;  %v1169_v40 = vmul.f32 1.442695, %v1139_v34 }
 0x5d7   :  { %v1171_v44 = vmul.f32 1.442695, %v1140_v35 }
 0x5d8   :  { %v1185_v41 = vrot.slane %v1184_v37, 4  ;;  %1633 = vpow2.f32 %v1165_v39 }
 0x5d9   :  { %v1626_v42 = vpop.eup %1625  ;;  %1635 = vpow2.f32 %v1167_v25 }
 0x5da   :  { %v1628_v45 = vpop.eup %1627  ;;  %v1186_v46 = vadd.f32 %v1185_v41, %v1184_v37  ;;  %1637 = vpow2.f32 %v1169_v40 }
 0x5db   :  { %v1191_v47 = vadd.f32 %v1628_v45, %v1626_v42  ;;  %v1630_v48 = vpop.eup %1629  ;;  %1639 = vpow2.f32 %v1171_v44 }
 0x5dc   :  { %v1187_v49 = vrot.slane %v1186_v46, 2  ;;  %v1632_v50 = vpop.eup %1631 }
 0x5dd   :  { %v1192_v52 = vadd.f32 %v1630_v48, %v1191_v47 }
 0x5de   :  { %v1188_v53 = vadd.f32 %v1187_v49, %v1186_v46 }
 0x5df   :  { %v1193_v54 = vadd.f32 %v1632_v50, %v1192_v52 }
 0x5e0   :  { %v1189_v55 = vrot.slane %v1188_v53, 1 }
 0x5e1   :  { %v1194_v56 = vrot.slane %v1193_v54, 4 }
 0x5e2   :  { %v1634_v58 = vpop.eup %1633  ;;  %v1190_v59 = vadd.f32 %v1189_v55, %v1188_v53 }
 0x5e3   :  { %v1636_v60 = vpop.eup %1635  ;;  %v1195_v61 = vadd.f32 %v1194_v56, %v1193_v54 }
 0x5e4   :  { %1641 = vrcp.f32 %v1190_v59  ;;  %v1200_v62 = vadd.f32 %v1636_v60, %v1634_v58  ;;  %v1638_v63 = vpop.eup %1637 }
 0x5e5   :  { %v1196_v0 = vrot.slane %v1195_v61, 2  ;;  %v1640_v2 = vpop.eup %1639 }
 0x5e6   :  { %v1201_v1 = vadd.f32 %v1638_v63, %v1200_v62 }
 0x5e7   :  { %v1197_v3 = vadd.f32 %v1196_v0, %v1195_v61 }
 0x5e8   :  { %v1202_v5 = vadd.f32 %v1640_v2, %v1201_v1 }
 0x5e9   :  { %v1198_v27 = vrot.slane %v1197_v3, 1 }
 0x5ea   :  { %v1203_v6 = vrot.slane %v1202_v5, 4 }
 0x5eb   :  { %v1199_v7 = vadd.f32 %v1198_v27, %v1197_v3 }
 0x5ec   :  { %v1204_v8 = vadd.f32 %v1203_v6, %v1202_v5 }
 0x5ed   :  { %1643 = vrcp.f32 %v1199_v7 }
 0x5ee   :  { %v1642_v9 = vpop.eup %1641  ;;  %v1205_v10 = vrot.slane %v1204_v8, 2 }
 0x5ef   :  { %v1215_v18 = vmul.f32 %v1642_v9, %v1618_v17  ;;  %v1216_v11 = vmul.f32 %v1642_v9, %v1620_v21  ;;  %v1217_v12 = vmul.f32 %v1642_v9, %v1622_v28  ;;  %v1218_v14 = vmul.f32 %v1642_v9, %v1624_v30 }
 0x5f0   :  { %v1206_v19 = vadd.f32 %v1205_v10, %v1204_v8 }
 0x5f1   :  { %v1240_v24 = vsel %vm1993_vm0, %v1215_v18, %v2009_v15  ;;  %v1241_v16 = vsel %vm1993_vm0, %v1216_v11, %v2006_v13  ;;  %v1242_v20 = vsel %vm1993_vm0, %v1217_v12, %v2014_v22  ;;  %v1243_v17 = vsel %vm1993_vm0, %v1218_v14, %v2017_v23 }
 0x5f2   :  { %1256 = vst [vmem:[#allocation4 + $0x20] sm:$0xff] %v1240_v24  ;;  %1257 = vst [vmem:[#allocation4 + $0x28] sm:$0xff] %v1241_v16  ;;  %v1207_v21 = vrot.slane %v1206_v19, 1 }
 0x5f3   :  { %1258 = vst [vmem:[#allocation4 + $0x30] sm:$0xff] %v1242_v20  ;;  %1259 = vst [vmem:[#allocation4 + $0x38] sm:$0xff] %v1243_v17 }
 0x5f4   :  { %v1208_v28 = vadd.f32 %v1207_v21, %v1206_v19 }
 0x5f6   :  { %1645 = vrcp.f32 %v1208_v28 }
 0x5f7   :  { %v1644_v15 = vpop.eup %1643 }
 0x5f8   :  { %v1220_v30 = vmul.f32 %v1644_v15, %v1626_v42  ;;  %v1221_v32 = vmul.f32 %v1644_v15, %v1628_v45  ;;  %v1222_v33 = vmul.f32 %v1644_v15, %v1630_v48  ;;  %v1223_v13 = vmul.f32 %v1644_v15, %v1632_v50 }
 0x5fa   :  { %v1244_v22 = vsel %vm1993_vm0, %v1220_v30, %v2025_v31  ;;  %v1245_v23 = vsel %vm1993_vm0, %v1221_v32, %v2021_v26  ;;  %v1246_v34 = vsel %vm1993_vm0, %v1222_v33, %v2030_v36  ;;  %v1247_v35 = vsel %vm1993_vm0, %v1223_v13, %v2033_v38 }
 0x5fb   :  { %1260 = vst [vmem:[#allocation4 + $0x40] sm:$0xff] %v1244_v22  ;;  %1261 = vst [vmem:[#allocation4 + $0x48] sm:$0xff] %v1245_v23 }
 0x5fc   :  { %1262 = vst [vmem:[#allocation4 + $0x50] sm:$0xff] %v1246_v34  ;;  %1263 = vst [vmem:[#allocation4 + $0x58] sm:$0xff] %v1247_v35 }
 0x600   :  { %v1646_v37 = vpop.eup %1645 }
 0x601   :  { %v1225_v31 = vmul.f32 %v1646_v37, %v1634_v58  ;;  %v1226_v39 = vmul.f32 %v1646_v37, %v1636_v60  ;;  %v1227_v25 = vmul.f32 %v1646_v37, %v1638_v63  ;;  %v1228_v40 = vmul.f32 %v1646_v37, %v1640_v2 }
 0x603   :  { %v1248_v26 = vsel %vm1993_vm0, %v1225_v31, %v2041_v43  ;;  %v1249_v36 = vsel %vm1993_vm0, %v1226_v39, %v2037_v29  ;;  %v1250_v38 = vsel %vm1993_vm0, %v1227_v25, %v2046_v51  ;;  %v1251_v41 = vsel %vm1993_vm0, %v1228_v40, %v2053_v57 }
 0x604   :  { %1264 = vst [vmem:[#allocation4 + $0x60] sm:$0xff] %v1248_v26  ;;  %1265 = vst [vmem:[#allocation4 + $0x68] sm:$0xff] %v1249_v36 }
 0x605   :  { %1266 = vst [vmem:[#allocation4 + $0x70] sm:$0xff] %v1250_v38  ;;  %1267 = vst [vmem:[#allocation4 + $0x78] sm:$0xff] %v1251_v41 }
 0x606   :  { %1658 = shalt.err (!%p1655_p4)
}
 0x607   :  { %s1659_s28 = scalar_lea.hbm %s2125_s12, 2048 }
 0x608   :  { %p1660_p5 = scmp.ne.s32.totalorder %s2125_s12, %s1659_s28  ;;  %p1663_p6 = scmp.lt.u32.totalorder %s1659_s28, %s2125_s12 }
 0x60a   :  { %p1665_p7 = pnand %p1663_p6, %p1660_p5 }
 0x60c   :  { %1668 = shalt.err (!%p1665_p7)
}
 0x60d   :  { %s1680_s5 = smov 128   ;;  %s1681_s2 = smov 8  }
 0x60e   :  { %1279 = dma.vmem_to_hbm [thread:$0]  %s1274_s7, 2048, %s2125_s12, [#allocation5], %s1680_s5, %s1680_s5, %s1681_s2  }
 0x60f   :  { %1669 = dma.done.wait [#allocation5], 2048  }
 0x610   :  { %1670 = vsyncadd [#allocation5], 4294965248 }
 0x611   :  { %1283 = vsyncpa [#allocation5], 1 }

</bundles_post_ra>
